<compile_context>
chip_gen: v7x
topology: tpu7x:2x2x1
jax: 0.10.0
libtpu: 0.0.40
codegen_flags: <defaults>
</compile_context>

<pallas_src>
import jax
import jax.numpy as jnp
from jax.experimental import pallas as pl
from jax.experimental.pallas import tpu as pltpu

LANE = 128   # pad hidden feature dims (VMEM-only) to full lane width
HID = (64, 32, 8)


def _round_up(n, m):
    return ((n + m - 1) // m) * m


def _leaky_relu(x, neg_slope=0.01):
    return jnp.where(x >= 0, x, neg_slope * x)


def dqn_kernel(x_ref,
               w1_ref, b1_ref,
               w2_ref, b2_ref,
               w3_ref, b3_ref,
               w4_ref, b4_ref,
               o_ref):
    # x_ref: (TB, S) f32 batch tile.  Weights bf16, biases f32.
    # Hidden widths are padded to 128 (VMEM only); input/output keep true widths.
    h = x_ref[...].astype(jnp.bfloat16)

    h = jnp.dot(h, w1_ref[...], preferred_element_type=jnp.float32) + b1_ref[...]
    h = _leaky_relu(h).astype(jnp.bfloat16)

    h = jnp.dot(h, w2_ref[...], preferred_element_type=jnp.float32) + b2_ref[...]
    h = _leaky_relu(h).astype(jnp.bfloat16)

    h = jnp.dot(h, w3_ref[...], preferred_element_type=jnp.float32) + b3_ref[...]
    h = _leaky_relu(h).astype(jnp.bfloat16)

    o_ref[...] = (jnp.dot(h, w4_ref[...], preferred_element_type=jnp.float32)
                  + b4_ref[...])


def prepare_params(params):
    """Pad only the *hidden* feature dims (64/32/8) up to 128 and cast weights
    to bf16.  The kernel-boundary dims (state_size in, action_size out) keep
    their true widths so no padded bytes cross HBM."""
    s = params["w1"].shape[0]
    a = params["w4"].shape[1]
    dims_in = (s, LANE, LANE, LANE)     # K dims seen by each layer's matmul
    dims_out = (LANE, LANE, LANE, a)    # N dims
    prepped = {}
    for i in range(1, 5):
        w = params[f"w{i}"]
        b = params[f"b{i}"]
        fi, fo = w.shape
        fi_p, fo_p = dims_in[i - 1], dims_out[i - 1]
        prepped[f"w{i}"] = jnp.pad(
            w, ((0, fi_p - fi), (0, fo_p - fo))).astype(jnp.bfloat16)
        prepped[f"b{i}"] = jnp.pad(
            b, ((0, 0), (0, fo_p - fo))).astype(jnp.float32)
    return prepped


def _choose_tile(B, tile_b):
    """Batch tile: big enough to amortize per-step overhead, small enough that
    the grid has >= 2 steps for moderate batches (v7x has 2 TensorCores).
    bf16 activations => 16-row sublane granule."""
    if B < 32:
        return 16
    granule = 256 if B >= 512 else 16
    half = _round_up((B + 1) // 2, granule)
    return min(tile_b, half)


def dqn_forward(x, prepped, action_size, tile_b=2048):
    """x: (batch, state_size) float32.  prepped: output of prepare_params()."""
    B, S = x.shape
    A = action_size
    assert prepped["w1"].shape[0] == S and prepped["w4"].shape[1] == A

    TB = _choose_tile(B, tile_b)
    Bp = _round_up(B, TB)
    if Bp != B:
        x = jnp.pad(x, ((0, Bp - B), (0, 0)))   # pad batch rows only

    args = (x,
            prepped["w1"], prepped["b1"],
            prepped["w2"], prepped["b2"],
            prepped["w3"], prepped["b3"],
            prepped["w4"], prepped["b4"])

    # Weights/biases: constant block index -> DMA'd once, VMEM-resident.
    resident = lambda arr: pl.BlockSpec(arr.shape, lambda i: (0, 0))

    flops = 2 * Bp * (S * HID[0] + HID[0] * HID[1] + HID[1] * HID[2] + HID[2] * A)
    bytes_accessed = (Bp * S * 4 + Bp * A * 4
                      + sum(int(a.size) * a.dtype.itemsize for a in args[1:]))

    out = pl.pallas_call(
        dqn_kernel,
        out_shape=jax.ShapeDtypeStruct((Bp, A), jnp.float32),
        grid=(Bp // TB,),
        in_specs=[pl.BlockSpec((TB, S), lambda i: (i, 0))]
                 + [resident(a) for a in args[1:]],
        out_specs=pl.BlockSpec((TB, A), lambda i: (i, 0)),
        compiler_params=pltpu.CompilerParams(
            dimension_semantics=("parallel",)),
        cost_estimate=pl.CostEstimate(
            flops=flops, transcendentals=0, bytes_accessed=bytes_accessed),
    )(*args)

    return out if Bp == B else out[:B]


def dqn_apply(x, params, prepped, action_size):
    """Recommended entry point: tiny batches (a handful of env states) are not
    worth a kernel launch; everything else goes through the Pallas kernel."""
    if x.shape[0] < 16:
        return dqn_reference(x, params)
    return dqn_forward(x, prepped, action_size)


def init_dqn_params(key, state_size, action_size):
    """Deterministic init mimicking nn.Linear default (U[-1/sqrt(in), 1/sqrt(in)]).
    Weights stored transposed, shape (in, out); biases as (1, out)."""
    dims = [(state_size, HID[0]), (HID[0], HID[1]), (HID[1], HID[2]),
            (HID[2], action_size)]
    params = {}
    for i, (fan_in, fan_out) in enumerate(dims, start=1):
        key, kw, kb = jax.random.split(key, 3)
        bound = 1.0 / (fan_in ** 0.5)
        params[f"w{i}"] = jax.random.uniform(
            kw, (fan_in, fan_out), jnp.float32, minval=-bound, maxval=bound)
        params[f"b{i}"] = jax.random.uniform(
            kb, (1, fan_out), jnp.float32, minval=-bound, maxval=bound)
    return params


def dqn_reference(x, params):
    """Plain-JAX reference with the same bf16-operand / f32-accumulate policy."""
    h = x.astype(jnp.bfloat16)
    for i in range(1, 4):
        h = jnp.dot(h, params[f"w{i}"].astype(jnp.bfloat16),
                    preferred_element_type=jnp.float32) + params[f"b{i}"]
        h = _leaky_relu(h).astype(jnp.bfloat16)
    return jnp.dot(h, params["w4"].astype(jnp.bfloat16),
                   preferred_element_type=jnp.float32) + params["b4"]


if __name__ == "__main__":
    state_size = 16
    action_size = 4

    key = jax.random.PRNGKey(0)
    params = init_dqn_params(key, state_size, action_size)
    prepped = prepare_params(params)

    # Main test: a replay-buffer-sized batch -> >= 2 grid steps (both v7x TCs).
    key, kx = jax.random.split(key)
    x_big = jax.random.normal(kx, (512, state_size), dtype=jnp.float32)
    out_big = jax.block_until_ready(dqn_forward(x_big, prepped, action_size))
    ref_big = dqn_reference(x_big, params)
    assert out_big.shape == (512, action_size)
    assert jnp.allclose(out_big, ref_big, atol=1e-4, rtol=1e-4), "mismatch (big batch)"

    # Ragged-batch test: exercises the batch-row padding / row-slice path.
    key, kx2 = jax.random.split(key)
    x_small = jax.random.normal(kx2, (3, state_size), dtype=jnp.float32)
    out_small = jax.block_until_ready(dqn_forward(x_small, prepped, action_size))
    ref_small = dqn_reference(x_small, params)
    assert out_small.shape == (3, action_size)
    assert jnp.allclose(out_small, ref_small, atol=1e-4, rtol=1e-4), "mismatch (small batch)"

    print("KERNEL_OK")
</pallas_src>

<mosaic_0001>
module attributes {stable_mosaic.version = 11 : i64} {
  func.func @dqn_kernel(%arg0: i32, %arg1: memref<256x16xf32, #tpu.memory_space<vmem>>, %arg2: memref<16x128xbf16, #tpu.memory_space<vmem>>, %arg3: memref<1x128xf32, #tpu.memory_space<vmem>>, %arg4: memref<128x128xbf16, #tpu.memory_space<vmem>>, %arg5: memref<1x128xf32, #tpu.memory_space<vmem>>, %arg6: memref<128x128xbf16, #tpu.memory_space<vmem>>, %arg7: memref<1x128xf32, #tpu.memory_space<vmem>>, %arg8: memref<128x4xbf16, #tpu.memory_space<vmem>>, %arg9: memref<1x4xf32, #tpu.memory_space<vmem>>, %arg10: memref<256x4xf32, #tpu.memory_space<vmem>>) attributes {dimension_semantics = [#tpu.dimension_semantics<parallel>], iteration_bounds = array<i64: 2>, scalar_prefetch = 0 : i64, scratch_operands = 0 : i64, tpu.core_type = #tpu.core_type<tc>, window_params = [{transform_indices = @transform_0, window_bounds = array<i64: 256, 16>}, {pipeline_mode = #tpu.pipeline_mode<synchronous>, transform_indices = @transform_1, window_bounds = array<i64: 16, 128>}, {pipeline_mode = #tpu.pipeline_mode<synchronous>, transform_indices = @transform_2, window_bounds = array<i64: 1, 128>}, {pipeline_mode = #tpu.pipeline_mode<synchronous>, transform_indices = @transform_3, window_bounds = array<i64: 128, 128>}, {pipeline_mode = #tpu.pipeline_mode<synchronous>, transform_indices = @transform_4, window_bounds = array<i64: 1, 128>}, {pipeline_mode = #tpu.pipeline_mode<synchronous>, transform_indices = @transform_5, window_bounds = array<i64: 128, 128>}, {pipeline_mode = #tpu.pipeline_mode<synchronous>, transform_indices = @transform_6, window_bounds = array<i64: 1, 128>}, {pipeline_mode = #tpu.pipeline_mode<synchronous>, transform_indices = @transform_7, window_bounds = array<i64: 128, 4>}, {pipeline_mode = #tpu.pipeline_mode<synchronous>, transform_indices = @transform_8, window_bounds = array<i64: 1, 4>}, {transform_indices = @transform_9, window_bounds = array<i64: 256, 4>}]} {
    %c0 = arith.constant 0 : index
    %c0_0 = arith.constant 0 : index
    %0 = vector.load %arg1[%c0, %c0_0] : memref<256x16xf32, #tpu.memory_space<vmem>>, vector<256x16xf32>
    %1 = arith.truncf %0 : vector<256x16xf32> to vector<256x16xbf16>
    %c0_1 = arith.constant 0 : index
    %c0_2 = arith.constant 0 : index
    %2 = vector.load %arg2[%c0_1, %c0_2] : memref<16x128xbf16, #tpu.memory_space<vmem>>, vector<16x128xbf16>
    %cst = arith.constant dense<0.000000e+00> : vector<256x128xf32>
    %3 = tpu.matmul %1, %2, %cst {dimension_numbers = #tpu.dot_dimension_numbers<[1], [0], [0], [1], [0, 0, 1, 1], [], []>} : vector<256x16xbf16>, vector<16x128xbf16>, vector<256x128xf32> -> vector<256x128xf32>
    %c0_3 = arith.constant 0 : index
    %c0_4 = arith.constant 0 : index
    %4 = vector.load %arg3[%c0_3, %c0_4] : memref<1x128xf32, #tpu.memory_space<vmem>>, vector<1x128xf32>
    %5 = vector.broadcast %4 : vector<1x128xf32> to vector<256x128xf32>
    %6 = arith.addf %3, %5 : vector<256x128xf32>
    %cst_5 = arith.constant 0.000000e+00 : f32
    %7 = vector.broadcast %cst_5 : f32 to vector<256x128xf32>
    %8 = arith.cmpf oge, %6, %7 : vector<256x128xf32>
    %cst_6 = arith.constant 0.00999999977 : f32
    %9 = vector.broadcast %cst_6 : f32 to vector<256x128xf32>
    %10 = arith.mulf %9, %6 : vector<256x128xf32>
    %11 = arith.select %8, %6, %10 : vector<256x128xi1>, vector<256x128xf32>
    %12 = arith.truncf %11 : vector<256x128xf32> to vector<256x128xbf16>
    %c0_7 = arith.constant 0 : index
    %c0_8 = arith.constant 0 : index
    %13 = vector.load %arg4[%c0_7, %c0_8] : memref<128x128xbf16, #tpu.memory_space<vmem>>, vector<128x128xbf16>
    %cst_9 = arith.constant dense<0.000000e+00> : vector<256x128xf32>
    %14 = tpu.matmul %12, %13, %cst_9 {dimension_numbers = #tpu.dot_dimension_numbers<[1], [0], [0], [1], [0, 0, 1, 1], [], []>} : vector<256x128xbf16>, vector<128x128xbf16>, vector<256x128xf32> -> vector<256x128xf32>
    %c0_10 = arith.constant 0 : index
    %c0_11 = arith.constant 0 : index
    %15 = vector.load %arg5[%c0_10, %c0_11] : memref<1x128xf32, #tpu.memory_space<vmem>>, vector<1x128xf32>
    %16 = vector.broadcast %15 : vector<1x128xf32> to vector<256x128xf32>
    %17 = arith.addf %14, %16 : vector<256x128xf32>
    %cst_12 = arith.constant 0.000000e+00 : f32
    %18 = vector.broadcast %cst_12 : f32 to vector<256x128xf32>
    %19 = arith.cmpf oge, %17, %18 : vector<256x128xf32>
    %cst_13 = arith.constant 0.00999999977 : f32
    %20 = vector.broadcast %cst_13 : f32 to vector<256x128xf32>
    %21 = arith.mulf %20, %17 : vector<256x128xf32>
    %22 = arith.select %19, %17, %21 : vector<256x128xi1>, vector<256x128xf32>
    %23 = arith.truncf %22 : vector<256x128xf32> to vector<256x128xbf16>
    %c0_14 = arith.constant 0 : index
    %c0_15 = arith.constant 0 : index
    %24 = vector.load %arg6[%c0_14, %c0_15] : memref<128x128xbf16, #tpu.memory_space<vmem>>, vector<128x128xbf16>
    %cst_16 = arith.constant dense<0.000000e+00> : vector<256x128xf32>
    %25 = tpu.matmul %23, %24, %cst_16 {dimension_numbers = #tpu.dot_dimension_numbers<[1], [0], [0], [1], [0, 0, 1, 1], [], []>} : vector<256x128xbf16>, vector<128x128xbf16>, vector<256x128xf32> -> vector<256x128xf32>
    %c0_17 = arith.constant 0 : index
    %c0_18 = arith.constant 0 : index
    %26 = vector.load %arg7[%c0_17, %c0_18] : memref<1x128xf32, #tpu.memory_space<vmem>>, vector<1x128xf32>
    %27 = vector.broadcast %26 : vector<1x128xf32> to vector<256x128xf32>
    %28 = arith.addf %25, %27 : vector<256x128xf32>
    %cst_19 = arith.constant 0.000000e+00 : f32
    %29 = vector.broadcast %cst_19 : f32 to vector<256x128xf32>
    %30 = arith.cmpf oge, %28, %29 : vector<256x128xf32>
    %cst_20 = arith.constant 0.00999999977 : f32
    %31 = vector.broadcast %cst_20 : f32 to vector<256x128xf32>
    %32 = arith.mulf %31, %28 : vector<256x128xf32>
    %33 = arith.select %30, %28, %32 : vector<256x128xi1>, vector<256x128xf32>
    %34 = arith.truncf %33 : vector<256x128xf32> to vector<256x128xbf16>
    %c0_21 = arith.constant 0 : index
    %c0_22 = arith.constant 0 : index
    %35 = vector.load %arg8[%c0_21, %c0_22] : memref<128x4xbf16, #tpu.memory_space<vmem>>, vector<128x4xbf16>
    %cst_23 = arith.constant dense<0.000000e+00> : vector<256x4xf32>
    %36 = tpu.matmul %34, %35, %cst_23 {dimension_numbers = #tpu.dot_dimension_numbers<[1], [0], [0], [1], [0, 0, 1, 1], [], []>} : vector<256x128xbf16>, vector<128x4xbf16>, vector<256x4xf32> -> vector<256x4xf32>
    %c0_24 = arith.constant 0 : index
    %c0_25 = arith.constant 0 : index
    %37 = vector.load %arg9[%c0_24, %c0_25] : memref<1x4xf32, #tpu.memory_space<vmem>>, vector<1x4xf32>
    %38 = vector.broadcast %37 : vector<1x4xf32> to vector<256x4xf32>
    %39 = arith.addf %36, %38 : vector<256x4xf32>
    %c0_26 = arith.constant 0 : index
    %c0_27 = arith.constant 0 : index
    %40 = vector.load %arg10[%c0_26, %c0_27] : memref<256x4xf32, #tpu.memory_space<vmem>>, vector<256x4xf32>
    tpu.vector_store %arg10[%c0_26, %c0_27], %39 {strides = array<i32>} : memref<256x4xf32, #tpu.memory_space<vmem>>, vector<256x4xf32>,
    return
  }
  func.func @transform_0(%arg0: i32) -> (i32, i32) {
    %c0_i32 = arith.constant 0 : i32
    %c0_i32_0 = arith.constant 0 : i32
    return %arg0, %c0_i32 : i32, i32
  }
  func.func @transform_1(%arg0: i32) -> (i32, i32) {
    %c0_i32 = arith.constant 0 : i32
    %c0_i32_0 = arith.constant 0 : i32
    %c0_i32_1 = arith.constant 0 : i32
    return %c0_i32, %c0_i32_0 : i32, i32
  }
  func.func @transform_2(%arg0: i32) -> (i32, i32) {
    %c0_i32 = arith.constant 0 : i32
    %c0_i32_0 = arith.constant 0 : i32
    %c0_i32_1 = arith.constant 0 : i32
    return %c0_i32, %c0_i32_0 : i32, i32
  }
  func.func @transform_3(%arg0: i32) -> (i32, i32) {
    %c0_i32 = arith.constant 0 : i32
    %c0_i32_0 = arith.constant 0 : i32
    %c0_i32_1 = arith.constant 0 : i32
    return %c0_i32, %c0_i32_0 : i32, i32
  }
  func.func @transform_4(%arg0: i32) -> (i32, i32) {
    %c0_i32 = arith.constant 0 : i32
    %c0_i32_0 = arith.constant 0 : i32
    %c0_i32_1 = arith.constant 0 : i32
    return %c0_i32, %c0_i32_0 : i32, i32
  }
  func.func @transform_5(%arg0: i32) -> (i32, i32) {
    %c0_i32 = arith.constant 0 : i32
    %c0_i32_0 = arith.constant 0 : i32
    %c0_i32_1 = arith.constant 0 : i32
    return %c0_i32, %c0_i32_0 : i32, i32
  }
  func.func @transform_6(%arg0: i32) -> (i32, i32) {
    %c0_i32 = arith.constant 0 : i32
    %c0_i32_0 = arith.constant 0 : i32
    %c0_i32_1 = arith.constant 0 : i32
    return %c0_i32, %c0_i32_0 : i32, i32
  }
  func.func @transform_7(%arg0: i32) -> (i32, i32) {
    %c0_i32 = arith.constant 0 : i32
    %c0_i32_0 = arith.constant 0 : i32
    %c0_i32_1 = arith.constant 0 : i32
    return %c0_i32, %c0_i32_0 : i32, i32
  }
  func.func @transform_8(%arg0: i32) -> (i32, i32) {
    %c0_i32 = arith.constant 0 : i32
    %c0_i32_0 = arith.constant 0 : i32
    %c0_i32_1 = arith.constant 0 : i32
    return %c0_i32, %c0_i32_0 : i32, i32
  }
  func.func @transform_9(%arg0: i32) -> (i32, i32) {
    %c0_i32 = arith.constant 0 : i32
    %c0_i32_0 = arith.constant 0 : i32
    return %arg0, %c0_i32 : i32, i32
  }
}

</mosaic_0001>

<bundles_post_ra>
// kernel: tpu_custom_call.1
= control target key start
LH: loop header
LB: loop body
LE: loop exit
PB: predicated region body
PF: predicated region fallthrough
CT: control target
= control target key end

     0   :  { %s2161_s30 = smov 0   ;;  %s2554_s0 = inlined_call_operand.vmem [shape: f32[512,16], index: 0, kind: input, shape index: {}]   ;;  %s2555_s1 = inlined_call_operand.vmem [shape: bf16[16,128], index: 1, kind: input, shape index: {}]   ;;  %s2556_s2 = inlined_call_operand.vmem [shape: f32[1,128], index: 2, kind: input, shape index: {}]   ;;  %s2557_s3 = inlined_call_operand.vmem [shape: bf16[128,128], index: 3, kind: input, shape index: {}]   ;;  %s2558_s4 = inlined_call_operand.vmem [shape: f32[1,128], index: 4, kind: input, shape index: {}]   ;;  %s2559_s5 = inlined_call_operand.vmem [shape: bf16[128,128], index: 5, kind: input, shape index: {}]   ;;  %s2560_s6 = inlined_call_operand.vmem [shape: f32[1,128], index: 6, kind: input, shape index: {}]   ;;  %s2561_s7 = inlined_call_operand.vmem [shape: bf16[128,4], index: 7, kind: input, shape index: {}]   ;;  %s2562_s8 = inlined_call_operand.vmem [shape: f32[1,4], index: 8, kind: input, shape index: {}]   ;;  %s2563_s9 = inlined_call_operand.vmem [shape: f32[512,4], index: 9, kind: output, shape index: {}]  }
   0x1 LB: > { %s1731_s10 = sadd.s32 4294967295, %s2109_s30   ;;  %p1735_p0 = scmp.ge.s32.totalorder %s2109_s30, 1  ;;  %s2109_s30 = sphi %s2161_s30, %s19_s30  }
   0x2   : > { %p288_p1 = scmp.lt.s32.totalorder %s2109_s30, 3 }
   0x4   : > { %p289_p2 = pnand %p1735_p0, %p288_p1 }
   0x5   : > { %v2078_v0 = vld [vmem:[%s2555_s1] sm:$0xff] (!%p289_p2)   ;;  %s1736_s13 = sshll.u32 (!%p289_p2), %s1731_s10, 5  ;;  %v2080_v2 = vld [vmem:[%s2557_s3 + $0x8] sm:$0xff] (!%p289_p2)   ;;  %v2081_v3 = vld [vmem:[%s2557_s3 + $0x10] sm:$0xff] (!%p289_p2)   ;;  %vm400_vm0 = vcmask (!%p289_p2), 130048  }
   0x6   : > { %292 = sbr.rel (%p289_p2) target bundleno = 963 (0x3c3), region = 56  ;;  %p325_p3 = scmp.lt.s32.totalorder (!%p289_p2), %s1736_s13, 63  ;;  %1876 = vmatprep.subr.bf16.mxu0 (!%p289_p2), %v2078_v0  ;;  %v2079_v1 = vld [vmem:[%s2557_s3] sm:$0xff] (!%p289_p2)   ;;  %v2082_v13 = vld [vmem:[%s2557_s3 + $0x18] sm:$0xff] (!%p289_p2)   ;;  %v2084_v54 = vld [vmem:[%s2557_s3 + $0x28] sm:$0xff] (!%p289_p2)  }
   0x7   : > { %1877 = vmatpush3.bf16.msra.mxu0 (!%p289_p2), %v2078_v0  ;;  %1910 = vmatprep.subr.bf16.mxu1 (!%p289_p2), %v2079_v1  ;;  %v2083_v18 = vld [vmem:[%s2557_s3 + $0x20] sm:$0xff] (!%p289_p2)   ;;  %v2085_v55 = vld [vmem:[%s2557_s3 + $0x30] sm:$0xff] (!%p289_p2)   ;;  %v2086_v56 = vld [vmem:[%s2557_s3 + $0x38] sm:$0xff] (!%p289_p2)  }
   0x8   : > { %1911 = vmatpush3.bf16.msra.mxu1 (!%p289_p2), %v2079_v1  ;;  %v2087_v57 = vld [vmem:[%s2559_s5] sm:$0xff] (!%p289_p2)   ;;  %v2088_v58 = vld [vmem:[%s2559_s5 + $0x8] sm:$0xff] (!%p289_p2)   ;;  %v2089_v59 = vld [vmem:[%s2559_s5 + $0x10] sm:$0xff] (!%p289_p2)  }
   0x9   : > { %1912 = vmatprep.subr.bf16.mxu1 (!%p289_p2), %v2080_v2  ;;  %1958 = vmatprep.subr.bf16.mxu0 (!%p289_p2), %v2087_v57  ;;  %v2090_v60 = vld [vmem:[%s2559_s5 + $0x18] sm:$0xff] (!%p289_p2)   ;;  %v2091_v61 = vld [vmem:[%s2559_s5 + $0x20] sm:$0xff] (!%p289_p2)   ;;  %v2092_v62 = vld [vmem:[%s2559_s5 + $0x28] sm:$0xff] (!%p289_p2)  }
   0xa   : > { %v2093_v63 = vld [vmem:[%s2559_s5 + $0x30] sm:$0xff] (!%p289_p2)   ;;  %v2278_v0 = vld [vmem:[%s2556_s2] ss:$0 sm:$0xff] (!%p289_p2) }
   0xc   : > { %1913 = vmatpush3.bf16.msra.mxu1 (!%p289_p2), %v2080_v2 }
   0xd   : > { %s2565_s13 = smov (!%p325_p3, %s1736_s13), 63  ;;  %1914 = vmatprep.subr.bf16.mxu1 %v2081_v3 }
   0xe   : > { %s1737_s18 = sshll.u32 %s2565_s13, 3 }
   0xf   : > { %s2186_s21 = scalar_lea.vmem %s2554_s0, %s1737_s18  ;;  %s2453_s22 = scalar_lea.vmem %s2563_s9, %s1737_s18 }
  0x10   : > { %v337_v4 = vld [vmem:[%s2186_s21] sm:$0xff]  ;;  %v338_v5 = vld [vmem:[%s2186_s21 + $0x8] sm:$0xff]  ;;  %v339_v6 = vld [vmem:[%s2186_s21 + $0x10] sm:$0xff]  ;;  %1915 = vmatpush3.bf16.msra.mxu1 %v2081_v3 }
  0x11   : > { %v369_v7 = vpack.c.bf16 %v338_v5, %v337_v4  ;;  %v340_v8 = vld [vmem:[%s2186_s21 + $0x18] sm:$0xff]  ;;  %v341_v9 = vld [vmem:[%s2186_s21 + $0x20] sm:$0xff]  ;;  %v342_v10 = vld [vmem:[%s2186_s21 + $0x28] sm:$0xff]  ;;  %1916 = vmatprep.subr.bf16.mxu1 %v2082_v13 }
  0x12   : > { %v370_v11 = vpack.c.bf16 %v340_v8, %v339_v6  ;;  %v371_v12 = vpack.c.bf16 %v342_v10, %v341_v9  ;;  %v343_v14 = vld [vmem:[%s2186_s21 + $0x30] sm:$0xff]  ;;  %v344_v15 = vld [vmem:[%s2186_s21 + $0x38] sm:$0xff]  ;;  %v345_v16 = vld [vmem:[%s2186_s21 + $0x40] sm:$0xff] }
  0x13   : > { %1878 = vmatprep.mubr.msk.bf16.mxu0 %vm400_vm0, %v369_v7  ;;  %v346_v17 = vld [vmem:[%s2186_s21 + $0x48] sm:$0xff]  ;;  %v372_v19 = vpack.c.bf16 %v344_v15, %v343_v14  ;;  %v347_v21 = vld [vmem:[%s2186_s21 + $0x50] sm:$0xff]  ;;  %v348_v22 = vld [vmem:[%s2186_s21 + $0x58] sm:$0xff] }
  0x14   : > { %1879 = vmatmul.mubr.msk.bf16.vlgmr.msra.gmra.mrb[0].mxu0 %vm400_vm0, %v370_v11  ;;  %v373_v20 = vpack.c.bf16 %v346_v17, %v345_v16  ;;  %1917 = vmatpush3.bf16.msra.mxu1 %v2082_v13  ;;  %v349_v23 = vld [vmem:[%s2186_s21 + $0x60] sm:$0xff]  ;;  %v350_v24 = vld [vmem:[%s2186_s21 + $0x68] sm:$0xff]  ;;  %v374_v25 = vpack.c.bf16 %v348_v22, %v347_v21  ;;  %v351_v27 = vld [vmem:[%s2186_s21 + $0x70] sm:$0xff] }
  0x15   : > { %1882 = vmatprep.mubr.msk.bf16.mxu0 %vm400_vm0, %v371_v12  ;;  %1918 = vmatprep.subr.bf16.mxu1 %v2083_v18  ;;  %v375_v26 = vpack.c.bf16 %v350_v24, %v349_v23  ;;  %v352_v28 = vld [vmem:[%s2186_s21 + $0x78] sm:$0xff]  ;;  %v353_v29 = vld [vmem:[%s2186_s21 + $0x80] sm:$0xff]  ;;  %v354_v30 = vld [vmem:[%s2186_s21 + $0x88] sm:$0xff] }
  0x16   : > { %v376_v31 = vpack.c.bf16 %v352_v28, %v351_v27  ;;  %v377_v32 = vpack.c.bf16 %v354_v30, %v353_v29  ;;  %v355_v33 = vld [vmem:[%s2186_s21 + $0x90] sm:$0xff]  ;;  %v356_v34 = vld [vmem:[%s2186_s21 + $0x98] sm:$0xff]  ;;  %v357_v35 = vld [vmem:[%s2186_s21 + $0xa0] sm:$0xff]  ;;  %1959 = vmatpush3.bf16.msra.mxu0 %v2087_v57 }
  0x17   : > { %v358_v36 = vld [vmem:[%s2186_s21 + $0xa8] sm:$0xff]  ;;  %v378_v37 = vpack.c.bf16 %v356_v34, %v355_v33  ;;  %v359_v39 = vld [vmem:[%s2186_s21 + $0xb0] sm:$0xff]  ;;  %v360_v40 = vld [vmem:[%s2186_s21 + $0xb8] sm:$0xff]  ;;  %1960 = vmatprep.subr.bf16.mxu0 %v2088_v58 }
  0x18   : > { %1919 = vmatpush3.bf16.msra.mxu1 %v2083_v18  ;;  %v379_v38 = vpack.c.bf16 %v358_v36, %v357_v35  ;;  %v361_v41 = vld [vmem:[%s2186_s21 + $0xc0] sm:$0xff]  ;;  %v362_v42 = vld [vmem:[%s2186_s21 + $0xc8] sm:$0xff]  ;;  %v380_v43 = vpack.c.bf16 %v360_v40, %v359_v39  ;;  %v363_v45 = vld [vmem:[%s2186_s21 + $0xd0] sm:$0xff] }
  0x19   : > { %v381_v44 = vpack.c.bf16 %v362_v42, %v361_v41  ;;  %v364_v46 = vld [vmem:[%s2186_s21 + $0xd8] sm:$0xff]  ;;  %v365_v47 = vld [vmem:[%s2186_s21 + $0xe0] sm:$0xff]  ;;  %v366_v48 = vld [vmem:[%s2186_s21 + $0xe8] sm:$0xff]  ;;  %1920 = vmatprep.subr.bf16.mxu1 %v2084_v54 }
  0x1a   : > { %v382_v49 = vpack.c.bf16 %v364_v46, %v363_v45  ;;  %v383_v50 = vpack.c.bf16 %v366_v48, %v365_v47  ;;  %v367_v51 = vld [vmem:[%s2186_s21 + $0xf0] sm:$0xff]  ;;  %v368_v52 = vld [vmem:[%s2186_s21 + $0xf8] sm:$0xff]  ;;  %1961 = vmatpush3.bf16.msra.mxu0 %v2088_v58 }
  0x1b   : > { %v384_v53 = vpack.c.bf16 %v368_v52, %v367_v51  ;;  %1962 = vmatprep.subr.bf16.mxu0 %v2089_v59 }
  0x1c   : > { %1883 = vmatmul.mubr.msk.bf16.gmra.mrb[4].mxu0 %vm400_vm0, %v372_v19  ;;  %1921 = vmatpush3.bf16.msra.mxu1 %v2084_v54 }
  0x1d   : > { %1886 = vmatprep.mubr.msk.bf16.mxu0 %vm400_vm0, %v373_v20  ;;  %1922 = vmatprep.subr.bf16.mxu1 %v2085_v55 }
  0x1e   : > { %1963 = vmatpush3.bf16.msra.mxu0 %v2089_v59 }
  0x1f   : > { %1964 = vmatprep.subr.bf16.mxu0 %v2090_v60 }
  0x20   : > { %1923 = vmatpush3.bf16.msra.mxu1 %v2085_v55 }
  0x21   : > { %1924 = vmatprep.subr.bf16.mxu1 %v2086_v56 }
  0x22   : > { %1965 = vmatpush3.bf16.msra.mxu0 %v2090_v60 }
  0x23   : > { %1966 = vmatprep.subr.bf16.mxu0 %v2091_v61 }
  0x24   : > { %1887 = vmatmul.mubr.msk.bf16.gmra.mrb[8].mxu0 %vm400_vm0, %v374_v25  ;;  %1925 = vmatpush3.bf16.msra.mxu1 %v2086_v56 }
  0x25   : > { %1890 = vmatprep.mubr.msk.bf16.mxu0 %vm400_vm0, %v375_v26 }
  0x26   : > { %1967 = vmatpush3.bf16.msra.mxu0 %v2091_v61 }
  0x27   : > { %1968 = vmatprep.subr.bf16.mxu0 %v2092_v62 }
  0x2a   : > { %1969 = vmatpush3.bf16.msra.mxu0 %v2092_v62 }
  0x2b   : > { %1970 = vmatprep.subr.bf16.mxu0 %v2093_v63 }
  0x2c   : > { %1891 = vmatmul.mubr.msk.bf16.gmra.mrb[12].mxu0 %vm400_vm0, %v376_v31 }
  0x2d   : > { %1894 = vmatprep.mubr.msk.bf16.mxu0 %vm400_vm0, %v377_v32 }
  0x2e   : > { %1971 = vmatpush3.bf16.msra.mxu0 %v2093_v63 }
  0x34   : > { %1895 = vmatmul.mubr.msk.bf16.gmra.mrb[16].mxu0 %vm400_vm0, %v378_v37 }
  0x35   : > { %1898 = vmatprep.mubr.msk.bf16.mxu0 %vm400_vm0, %v379_v38 }
  0x3c   : > { %1899 = vmatmul.mubr.msk.bf16.gmra.mrb[20].mxu0 %vm400_vm0, %v380_v43 }
  0x3d   : > { %1902 = vmatprep.mubr.msk.bf16.mxu0 %vm400_vm0, %v381_v44 }
  0x44   : > { %1903 = vmatmul.mubr.msk.bf16.gmra.mrb[24].mxu0 %vm400_vm0, %v382_v49 }
  0x45   : > { %1906 = vmatprep.mubr.msk.bf16.mxu0 %vm400_vm0, %v383_v50 }
  0x4c   : > { %1907 = vmatmul.mubr.msk.bf16.gmra.mrb[28].mxu0 %vm400_vm0, %v384_v53 }
  0xe7   : > { %v1880_v1 = vpop.f32.mrb[0].mxu0 }
  0xe8   : > { %v492_v2 = vadd.f32 %v1880_v1, %v2278_v0  ;;  %v483_v3 = vpop.f32.mrb[1].mxu0 }
  0xe9   : > { %v484_v4 = vadd.f32 %v2278_v0, %v483_v3  ;;  %v1881_v5 = vpop.f32.mrb[2].mxu0 }
  0xea   : > { %v644_v6 = vmul.f32 0.01, %v492_v2  ;;  %v495_v7 = vadd.f32 %v1881_v5, %v2278_v0  ;;  %v486_v8 = vpop.f32.mrb[3].mxu0  ;;  %vm612_vm1 = vcmp.ge.f32.partialorder %v492_v2, 0.0 }
  0xeb   : > { %v642_v9 = vmul.f32 0.01, %v484_v4  ;;  %v487_v10 = vadd.f32 %v2278_v0, %v486_v8  ;;  %vm610_vm3 = vcmp.ge.f32.partialorder %v484_v4, 0.0 }
  0xec   : > { %vm613_vm2 = vcmp.ge.f32.partialorder %v495_v7, 0.0  ;;  %v645_v11 = vmul.f32 0.01, %v495_v7  ;;  %v676_v13 = vsel %vm612_vm1, %v492_v2, %v644_v6 }
  0xed   : > { %v643_v12 = vmul.f32 0.01, %v487_v10  ;;  %vm611_vm4 = vcmp.ge.f32.partialorder %v487_v10, 0.0  ;;  %v674_v16 = vsel %vm610_vm3, %v484_v4, %v642_v9 }
  0xee   : > { %v677_v14 = vsel %vm613_vm2, %v495_v7, %v645_v11 }
  0xef   : > { %v1884_v15 = vpop.f32.mrb[4].mxu0  ;;  %v675_v17 = vsel %vm611_vm4, %v487_v10, %v643_v12  ;;  %v707_v18 = vpack.c.bf16 %v677_v14, %v676_v13 }
  0xf0   : > { %v508_v19 = vadd.f32 %v1884_v15, %v2278_v0  ;;  %v499_v20 = vpop.f32.mrb[5].mxu0  ;;  %v706_v21 = vpack.c.bf16 %v675_v17, %v674_v16 }
  0xf1   : > { %v500_v22 = vadd.f32 %v2278_v0, %v499_v20  ;;  %v1885_v23 = vpop.f32.mrb[6].mxu0 }
  0xf2   : > { %v648_v24 = vmul.f32 0.01, %v508_v19  ;;  %v511_v25 = vadd.f32 %v1885_v23, %v2278_v0  ;;  %v502_v26 = vpop.f32.mrb[7].mxu0  ;;  %1926 = vmatprep.mubr.bf16.mxu1 %v706_v21  ;;  %vm616_vm5 = vcmp.ge.f32.partialorder %v508_v19, 0.0 }
  0xf3   : > { %v646_v27 = vmul.f32 0.01, %v500_v22  ;;  %v503_v28 = vadd.f32 %v2278_v0, %v502_v26  ;;  %1927 = vmatmul.mubr.bf16.vlgmr.msra.gmra.mrb[0].mxu1 %v707_v18  ;;  %vm614_vm6 = vcmp.ge.f32.partialorder %v500_v22, 0.0 }
  0xf4   : > { %vm617_vm7 = vcmp.ge.f32.partialorder %v511_v25, 0.0  ;;  %v649_v29 = vmul.f32 0.01, %v511_v25  ;;  %v680_v31 = vsel %vm616_vm5, %v508_v19, %v648_v24 }
  0xf5   : > { %vm615_vm8 = vcmp.ge.f32.partialorder %v503_v28, 0.0  ;;  %v647_v30 = vmul.f32 0.01, %v503_v28  ;;  %v678_v34 = vsel %vm614_vm6, %v500_v22, %v646_v27 }
  0xf6   : > { %v681_v32 = vsel %vm617_vm7, %v511_v25, %v649_v29 }
  0xf7   : > { %v1888_v33 = vpop.f32.mrb[8].mxu0  ;;  %v679_v35 = vsel %vm615_vm8, %v503_v28, %v647_v30  ;;  %v709_v36 = vpack.c.bf16 %v681_v32, %v680_v31 }
  0xf8   : > { %v524_v37 = vadd.f32 %v1888_v33, %v2278_v0  ;;  %v515_v38 = vpop.f32.mrb[9].mxu0  ;;  %v708_v39 = vpack.c.bf16 %v679_v35, %v678_v34 }
  0xf9   : > { %v516_v40 = vadd.f32 %v2278_v0, %v515_v38  ;;  %v1889_v41 = vpop.f32.mrb[10].mxu0 }
  0xfa   : > { %v652_v42 = vmul.f32 0.01, %v524_v37  ;;  %v527_v43 = vadd.f32 %v1889_v41, %v2278_v0  ;;  %v518_v44 = vpop.f32.mrb[11].mxu0  ;;  %1930 = vmatprep.mubr.bf16.mxu1 %v708_v39  ;;  %vm620_vm9 = vcmp.ge.f32.partialorder %v524_v37, 0.0 }
  0xfb   : > { %v650_v45 = vmul.f32 0.01, %v516_v40  ;;  %v519_v46 = vadd.f32 %v2278_v0, %v518_v44  ;;  %1931 = vmatmul.mubr.bf16.gmra.mrb[4].mxu1 %v709_v36  ;;  %vm618_vm10 = vcmp.ge.f32.partialorder %v516_v40, 0.0 }
  0xfc   : > { %vm621_vm11 = vcmp.ge.f32.partialorder %v527_v43, 0.0  ;;  %v653_v47 = vmul.f32 0.01, %v527_v43  ;;  %v684_v49 = vsel %vm620_vm9, %v524_v37, %v652_v42 }
  0xfd   : > { %vm619_vm12 = vcmp.ge.f32.partialorder %v519_v46, 0.0  ;;  %v651_v48 = vmul.f32 0.01, %v519_v46  ;;  %v682_v52 = vsel %vm618_vm10, %v516_v40, %v650_v45 }
  0xfe   : > { %v685_v50 = vsel %vm621_vm11, %v527_v43, %v653_v47 }
  0xff   : > { %v1892_v51 = vpop.f32.mrb[12].mxu0  ;;  %v683_v53 = vsel %vm619_vm12, %v519_v46, %v651_v48  ;;  %v711_v54 = vpack.c.bf16 %v685_v50, %v684_v49 }
 0x100   : > { %v540_v55 = vadd.f32 %v1892_v51, %v2278_v0  ;;  %v531_v56 = vpop.f32.mrb[13].mxu0  ;;  %v710_v57 = vpack.c.bf16 %v683_v53, %v682_v52 }
 0x101   : > { %v532_v58 = vadd.f32 %v2278_v0, %v531_v56  ;;  %v1893_v59 = vpop.f32.mrb[14].mxu0 }
 0x102   : > { %v656_v60 = vmul.f32 0.01, %v540_v55  ;;  %v543_v61 = vadd.f32 %v1893_v59, %v2278_v0  ;;  %v534_v62 = vpop.f32.mrb[15].mxu0  ;;  %1934 = vmatprep.mubr.bf16.mxu1 %v710_v57  ;;  %vm624_vm13 = vcmp.ge.f32.partialorder %v540_v55, 0.0 }
 0x103   : > { %v654_v63 = vmul.f32 0.01, %v532_v58  ;;  %v535_v1 = vadd.f32 %v2278_v0, %v534_v62  ;;  %1935 = vmatmul.mubr.bf16.gmra.mrb[8].mxu1 %v711_v54  ;;  %vm622_vm14 = vcmp.ge.f32.partialorder %v532_v58, 0.0 }
 0x104   : > { %vm625_vm15 = vcmp.ge.f32.partialorder %v543_v61, 0.0  ;;  %v657_v2 = vmul.f32 0.01, %v543_v61  ;;  %v688_v4 = vsel %vm624_vm13, %v540_v55, %v656_v60 }
 0x105   : > { %vm623_vm0 = vcmp.ge.f32.partialorder %v535_v1, 0.0  ;;  %v655_v3 = vmul.f32 0.01, %v535_v1  ;;  %v686_v7 = vsel %vm622_vm14, %v532_v58, %v654_v63 }
 0x106   : > { %v689_v5 = vsel %vm625_vm15, %v543_v61, %v657_v2 }
 0x107   : > { %v1896_v6 = vpop.f32.mrb[16].mxu0  ;;  %v687_v8 = vsel %vm623_vm0, %v535_v1, %v655_v3  ;;  %v713_v9 = vpack.c.bf16 %v689_v5, %v688_v4 }
 0x108   : > { %v556_v10 = vadd.f32 %v1896_v6, %v2278_v0  ;;  %v547_v11 = vpop.f32.mrb[17].mxu0  ;;  %v712_v12 = vpack.c.bf16 %v687_v8, %v686_v7 }
 0x109   : > { %v548_v13 = vadd.f32 %v2278_v0, %v547_v11  ;;  %v1897_v14 = vpop.f32.mrb[18].mxu0 }
 0x10a   : > { %v660_v15 = vmul.f32 0.01, %v556_v10  ;;  %v559_v16 = vadd.f32 %v1897_v14, %v2278_v0  ;;  %v550_v17 = vpop.f32.mrb[19].mxu0  ;;  %1938 = vmatprep.mubr.bf16.mxu1 %v712_v12  ;;  %vm628_vm1 = vcmp.ge.f32.partialorder %v556_v10, 0.0 }
 0x10b   : > { %v658_v18 = vmul.f32 0.01, %v548_v13  ;;  %v551_v19 = vadd.f32 %v2278_v0, %v550_v17  ;;  %1939 = vmatmul.mubr.bf16.gmra.mrb[12].mxu1 %v713_v9  ;;  %vm626_vm2 = vcmp.ge.f32.partialorder %v548_v13, 0.0 }
 0x10c   : > { %vm629_vm3 = vcmp.ge.f32.partialorder %v559_v16, 0.0  ;;  %v661_v20 = vmul.f32 0.01, %v559_v16  ;;  %v692_v22 = vsel %vm628_vm1, %v556_v10, %v660_v15 }
 0x10d   : > { %vm627_vm4 = vcmp.ge.f32.partialorder %v551_v19, 0.0  ;;  %v659_v21 = vmul.f32 0.01, %v551_v19  ;;  %v690_v25 = vsel %vm626_vm2, %v548_v13, %v658_v18 }
 0x10e   : > { %v693_v23 = vsel %vm629_vm3, %v559_v16, %v661_v20  ;;  %v2321_v20 = vld [vmem:[%s2561_s7 + $0x8] sm:$0xff]  }
 0x10f   : > { %v1900_v24 = vpop.f32.mrb[20].mxu0  ;;  %v691_v26 = vsel %vm627_vm4, %v551_v19, %v659_v21  ;;  %v715_v27 = vpack.c.bf16 %v693_v23, %v692_v22  ;;  %v2094_v19 = vld [vmem:[%s2559_s5 + $0x38] sm:$0xff]   ;;  %v2327_v21 = vld [vmem:[%s2561_s7 + $0x10] sm:$0xff]   ;;  %v2341_v23 = vld [vmem:[%s2561_s7 + $0x20] sm:$0xff]  }
 0x110   : > { %v572_v28 = vadd.f32 %v1900_v24, %v2278_v0  ;;  %v563_v29 = vpop.f32.mrb[21].mxu0  ;;  %v714_v30 = vpack.c.bf16 %v691_v26, %v690_v25  ;;  %1972 = vmatprep.subr.bf16.mxu0 %v2094_v19  ;;  %v2334_v22 = vld [vmem:[%s2561_s7 + $0x18] sm:$0xff]   ;;  %v2348_v24 = vld [vmem:[%s2561_s7 + $0x28] sm:$0xff]   ;;  %v2356_v25 = vld [vmem:[%s2558_s4] ss:$0 sm:$0xff] }
 0x111   : > { %v564_v31 = vadd.f32 %v2278_v0, %v563_v29  ;;  %v1901_v32 = vpop.f32.mrb[22].mxu0  ;;  %1973 = vmatpush3.bf16.msra.mxu0 %v2094_v19 }
 0x112   : > { %v664_v33 = vmul.f32 0.01, %v572_v28  ;;  %v575_v34 = vadd.f32 %v1901_v32, %v2278_v0  ;;  %v566_v35 = vpop.f32.mrb[23].mxu0  ;;  %1942 = vmatprep.mubr.bf16.mxu1 %v714_v30  ;;  %vm632_vm5 = vcmp.ge.f32.partialorder %v572_v28, 0.0 }
 0x113   : > { %v662_v36 = vmul.f32 0.01, %v564_v31  ;;  %v567_v37 = vadd.f32 %v2278_v0, %v566_v35  ;;  %1943 = vmatmul.mubr.bf16.gmra.mrb[16].mxu1 %v715_v27  ;;  %vm630_vm6 = vcmp.ge.f32.partialorder %v564_v31, 0.0 }
 0x114   : > { %vm633_vm7 = vcmp.ge.f32.partialorder %v575_v34, 0.0  ;;  %v665_v38 = vmul.f32 0.01, %v575_v34  ;;  %v696_v40 = vsel %vm632_vm5, %v572_v28, %v664_v33 }
 0x115   : > { %vm631_vm8 = vcmp.ge.f32.partialorder %v567_v37, 0.0  ;;  %v663_v39 = vmul.f32 0.01, %v567_v37  ;;  %v694_v43 = vsel %vm630_vm6, %v564_v31, %v662_v36 }
 0x116   : > { %v697_v41 = vsel %vm633_vm7, %v575_v34, %v665_v38 }
 0x117   : > { %v1904_v42 = vpop.f32.mrb[24].mxu0  ;;  %v695_v44 = vsel %vm631_vm8, %v567_v37, %v663_v39  ;;  %v717_v45 = vpack.c.bf16 %v697_v41, %v696_v40 }
 0x118   : > { %v588_v46 = vadd.f32 %v1904_v42, %v2278_v0  ;;  %v579_v47 = vpop.f32.mrb[25].mxu0  ;;  %v716_v48 = vpack.c.bf16 %v695_v44, %v694_v43 }
 0x119   : > { %v580_v49 = vadd.f32 %v2278_v0, %v579_v47  ;;  %v1905_v50 = vpop.f32.mrb[26].mxu0 }
 0x11a   : > { %v668_v51 = vmul.f32 0.01, %v588_v46  ;;  %v591_v52 = vadd.f32 %v1905_v50, %v2278_v0  ;;  %v582_v53 = vpop.f32.mrb[27].mxu0  ;;  %1946 = vmatprep.mubr.bf16.mxu1 %v716_v48  ;;  %vm636_vm9 = vcmp.ge.f32.partialorder %v588_v46, 0.0 }
 0x11b   : > { %v666_v54 = vmul.f32 0.01, %v580_v49  ;;  %v583_v55 = vadd.f32 %v2278_v0, %v582_v53  ;;  %1947 = vmatmul.mubr.bf16.gmra.mrb[20].mxu1 %v717_v45  ;;  %vm634_vm10 = vcmp.ge.f32.partialorder %v580_v49, 0.0 }
 0x11c   : > { %vm637_vm11 = vcmp.ge.f32.partialorder %v591_v52, 0.0  ;;  %v669_v56 = vmul.f32 0.01, %v591_v52  ;;  %v700_v58 = vsel %vm636_vm9, %v588_v46, %v668_v51 }
 0x11d   : > { %vm635_vm12 = vcmp.ge.f32.partialorder %v583_v55, 0.0  ;;  %v667_v57 = vmul.f32 0.01, %v583_v55  ;;  %v698_v61 = vsel %vm634_vm10, %v580_v49, %v666_v54 }
 0x11e   : > { %v701_v59 = vsel %vm637_vm11, %v591_v52, %v669_v56 }
 0x11f   : > { %v1908_v60 = vpop.f32.mrb[28].mxu0  ;;  %v699_v62 = vsel %vm635_vm12, %v583_v55, %v667_v57  ;;  %v719_v63 = vpack.c.bf16 %v701_v59, %v700_v58 }
 0x120   : > { %v604_v1 = vadd.f32 %v1908_v60, %v2278_v0  ;;  %v595_v2 = vpop.f32.mrb[29].mxu0  ;;  %v718_v3 = vpack.c.bf16 %v699_v62, %v698_v61 }
 0x121   : > { %v596_v4 = vadd.f32 %v2278_v0, %v595_v2  ;;  %v1909_v5 = vpop.f32.mrb[30].mxu0 }
 0x122   : > { %v672_v6 = vmul.f32 0.01, %v604_v1  ;;  %v607_v7 = vadd.f32 %v1909_v5, %v2278_v0  ;;  %v598_v8 = vpop.f32.mrb[31].mxu0  ;;  %1950 = vmatprep.mubr.bf16.mxu1 %v718_v3  ;;  %vm640_vm13 = vcmp.ge.f32.partialorder %v604_v1, 0.0 }
 0x123   : > { %v670_v9 = vmul.f32 0.01, %v596_v4  ;;  %v599_v10 = vadd.f32 %v2278_v0, %v598_v8  ;;  %1951 = vmatmul.mubr.bf16.gmra.mrb[24].mxu1 %v719_v63  ;;  %vm638_vm14 = vcmp.ge.f32.partialorder %v596_v4, 0.0  ;;  %v2095_v0 = vld [vmem:[%s2561_s7] sm:$0xff]  }
 0x124   : > { %vm641_vm15 = vcmp.ge.f32.partialorder %v607_v7, 0.0  ;;  %v673_v11 = vmul.f32 0.01, %v607_v7  ;;  %v704_v13 = vsel %vm640_vm13, %v604_v1, %v672_v6  ;;  %2054 = vmatprep.subr.bf16.mxu1 %v2095_v0  ;;  %2006 = vmatprep.subr.bf16.mxu0 %v2095_v0 }
 0x125   : > { %vm639_vm0 = vcmp.ge.f32.partialorder %v599_v10, 0.0  ;;  %v671_v12 = vmul.f32 0.01, %v599_v10  ;;  %v702_v15 = vsel %vm638_vm14, %v596_v4, %v670_v9  ;;  %2062 = vmatpush3.bf16.msra.mxu1 %v2095_v0 }
 0x126   : > { %v705_v14 = vsel %vm641_vm15, %v607_v7, %v673_v11  ;;  %2055 = vmatprep.subr.bf16.mxu1 %v2321_v20 }
 0x127   : > { %v703_v16 = vsel %vm639_vm0, %v599_v10, %v671_v12  ;;  %v721_v17 = vpack.c.bf16 %v705_v14, %v704_v13 }
 0x128   : > { %v720_v18 = vpack.c.bf16 %v703_v16, %v702_v15 }
 0x129   : > { %2063 = vmatpush3.bf16.msra.mxu1 %v2321_v20 }
 0x12a   : > { %1954 = vmatprep.mubr.bf16.mxu1 %v720_v18  ;;  %2056 = vmatprep.subr.bf16.mxu1 %v2327_v21 }
 0x12b   : > { %1955 = vmatmul.mubr.bf16.gmra.mrb[28].mxu1 %v721_v17 }
 0x12d   : > { %2064 = vmatpush3.bf16.msra.mxu1 %v2327_v21 }
 0x12e   : > { %2057 = vmatprep.subr.bf16.mxu1 %v2334_v22 }
 0x131   : > { %2065 = vmatpush3.bf16.msra.mxu1 %v2334_v22 }
 0x132   : > { %2058 = vmatprep.subr.bf16.mxu1 %v2341_v23 }
 0x135   : > { %2066 = vmatpush3.bf16.msra.mxu1 %v2341_v23 }
 0x136   : > { %2059 = vmatprep.subr.bf16.mxu1 %v2348_v24 }
 0x139   : > { %2067 = vmatpush3.bf16.msra.mxu1 %v2348_v24 }
 0x1c6   : > { %v1928_v26 = vpop.f32.mrb[0].mxu1 }
 0x1c7   : > { %v836_v27 = vadd.f32 %v1928_v26, %v2356_v25  ;;  %v827_v28 = vpop.f32.mrb[1].mxu1 }
 0x1c8   : > { %v828_v29 = vadd.f32 %v2356_v25, %v827_v28  ;;  %v1929_v30 = vpop.f32.mrb[2].mxu1 }
 0x1c9   : > { %v988_v31 = vmul.f32 0.01, %v836_v27  ;;  %v839_v32 = vadd.f32 %v1929_v30, %v2356_v25  ;;  %v830_v33 = vpop.f32.mrb[3].mxu1  ;;  %vm956_vm1 = vcmp.ge.f32.partialorder %v836_v27, 0.0 }
 0x1ca   : > { %v986_v34 = vmul.f32 0.01, %v828_v29  ;;  %v831_v35 = vadd.f32 %v2356_v25, %v830_v33  ;;  %vm954_vm2 = vcmp.ge.f32.partialorder %v828_v29, 0.0 }
 0x1cb   : > { %vm957_vm3 = vcmp.ge.f32.partialorder %v839_v32, 0.0  ;;  %v989_v36 = vmul.f32 0.01, %v839_v32  ;;  %v1020_v38 = vsel %vm956_vm1, %v836_v27, %v988_v31 }
 0x1cc   : > { %vm955_vm4 = vcmp.ge.f32.partialorder %v831_v35, 0.0  ;;  %v987_v37 = vmul.f32 0.01, %v831_v35  ;;  %v1018_v42 = vsel %vm954_vm2, %v828_v29, %v986_v34 }
 0x1cd   : > { %v1021_v39 = vsel %vm957_vm3, %v839_v32, %v989_v36 }
 0x1ce   : > { %v1051_v40 = vpack.c.bf16 %v1021_v39, %v1020_v38  ;;  %v1932_v41 = vpop.f32.mrb[4].mxu1  ;;  %v1019_v43 = vsel %vm955_vm4, %v831_v35, %v987_v37 }
 0x1cf   : > { %v852_v44 = vadd.f32 %v1932_v41, %v2356_v25  ;;  %v843_v45 = vpop.f32.mrb[5].mxu1  ;;  %v1050_v46 = vpack.c.bf16 %v1019_v43, %v1018_v42 }
 0x1d0   : > { %v844_v47 = vadd.f32 %v2356_v25, %v843_v45  ;;  %v1933_v48 = vpop.f32.mrb[6].mxu1 }
 0x1d1   : > { %v992_v49 = vmul.f32 0.01, %v852_v44  ;;  %v855_v50 = vadd.f32 %v1933_v48, %v2356_v25  ;;  %v846_v51 = vpop.f32.mrb[7].mxu1  ;;  %1974 = vmatprep.mubr.bf16.mxu0 %v1050_v46  ;;  %vm960_vm5 = vcmp.ge.f32.partialorder %v852_v44, 0.0 }
 0x1d2   : > { %v990_v52 = vmul.f32 0.01, %v844_v47  ;;  %v847_v53 = vadd.f32 %v2356_v25, %v846_v51  ;;  %1975 = vmatmul.mubr.bf16.vlgmr.msra.gmra.mrb[32].mxu0 %v1051_v40  ;;  %vm958_vm6 = vcmp.ge.f32.partialorder %v844_v47, 0.0 }
 0x1d3   : > { %vm961_vm7 = vcmp.ge.f32.partialorder %v855_v50, 0.0  ;;  %v993_v54 = vmul.f32 0.01, %v855_v50  ;;  %2007 = vmatpush3.bf16.msra.mxu0 %v2095_v0  ;;  %v1024_v56 = vsel %vm960_vm5, %v852_v44, %v992_v49 }
 0x1d4   : > { %vm959_vm8 = vcmp.ge.f32.partialorder %v847_v53, 0.0  ;;  %v991_v55 = vmul.f32 0.01, %v847_v53  ;;  %2008 = vmatprep.subr.bf16.mxu0 %v2321_v20  ;;  %v1022_v59 = vsel %vm958_vm6, %v844_v47, %v990_v52 }
 0x1d5   : > { %v1025_v57 = vsel %vm961_vm7, %v855_v50, %v993_v54 }
 0x1d6   : > { %v1936_v58 = vpop.f32.mrb[8].mxu1  ;;  %v1023_v60 = vsel %vm959_vm8, %v847_v53, %v991_v55  ;;  %v1053_v61 = vpack.c.bf16 %v1025_v57, %v1024_v56 }
 0x1d7   : > { %v868_v62 = vadd.f32 %v1936_v58, %v2356_v25  ;;  %v859_v63 = vpop.f32.mrb[9].mxu1  ;;  %v1052_v1 = vpack.c.bf16 %v1023_v60, %v1022_v59  ;;  %2009 = vmatpush3.bf16.msra.mxu0 %v2321_v20 }
 0x1d8   : > { %v860_v2 = vadd.f32 %v2356_v25, %v859_v63  ;;  %v1937_v3 = vpop.f32.mrb[10].mxu1  ;;  %2010 = vmatprep.subr.bf16.mxu0 %v2327_v21 }
 0x1d9   : > { %v996_v4 = vmul.f32 0.01, %v868_v62  ;;  %v871_v5 = vadd.f32 %v1937_v3, %v2356_v25  ;;  %v862_v6 = vpop.f32.mrb[11].mxu1  ;;  %1978 = vmatprep.mubr.bf16.mxu0 %v1052_v1  ;;  %vm964_vm9 = vcmp.ge.f32.partialorder %v868_v62, 0.0 }
 0x1da   : > { %v994_v7 = vmul.f32 0.01, %v860_v2  ;;  %v863_v8 = vadd.f32 %v2356_v25, %v862_v6  ;;  %1979 = vmatmul.mubr.bf16.gmra.mrb[36].mxu0 %v1053_v61  ;;  %vm962_vm10 = vcmp.ge.f32.partialorder %v860_v2, 0.0 }
 0x1db   : > { %vm965_vm11 = vcmp.ge.f32.partialorder %v871_v5, 0.0  ;;  %v997_v9 = vmul.f32 0.01, %v871_v5  ;;  %2011 = vmatpush3.bf16.msra.mxu0 %v2327_v21  ;;  %v1028_v11 = vsel %vm964_vm9, %v868_v62, %v996_v4 }
 0x1dc   : > { %vm963_vm12 = vcmp.ge.f32.partialorder %v863_v8, 0.0  ;;  %v995_v10 = vmul.f32 0.01, %v863_v8  ;;  %2012 = vmatprep.subr.bf16.mxu0 %v2334_v22  ;;  %v1026_v14 = vsel %vm962_vm10, %v860_v2, %v994_v7 }
 0x1dd   : > { %v1029_v12 = vsel %vm965_vm11, %v871_v5, %v997_v9 }
 0x1de   : > { %v1940_v13 = vpop.f32.mrb[12].mxu1  ;;  %v1027_v15 = vsel %vm963_vm12, %v863_v8, %v995_v10  ;;  %v1055_v16 = vpack.c.bf16 %v1029_v12, %v1028_v11 }
 0x1df   : > { %v884_v17 = vadd.f32 %v1940_v13, %v2356_v25  ;;  %v875_v18 = vpop.f32.mrb[13].mxu1  ;;  %v1054_v19 = vpack.c.bf16 %v1027_v15, %v1026_v14  ;;  %2013 = vmatpush3.bf16.msra.mxu0 %v2334_v22 }
 0x1e0   : > { %v876_v0 = vadd.f32 %v2356_v25, %v875_v18  ;;  %v1941_v20 = vpop.f32.mrb[14].mxu1  ;;  %2014 = vmatprep.subr.bf16.mxu0 %v2341_v23 }
 0x1e1   : > { %v1000_v21 = vmul.f32 0.01, %v884_v17  ;;  %v887_v26 = vadd.f32 %v1941_v20, %v2356_v25  ;;  %v878_v27 = vpop.f32.mrb[15].mxu1  ;;  %1982 = vmatprep.mubr.bf16.mxu0 %v1054_v19  ;;  %vm968_vm13 = vcmp.ge.f32.partialorder %v884_v17, 0.0 }
 0x1e2   : > { %v998_v28 = vmul.f32 0.01, %v876_v0  ;;  %v879_v29 = vadd.f32 %v2356_v25, %v878_v27  ;;  %1983 = vmatmul.mubr.bf16.gmra.mrb[40].mxu0 %v1055_v16  ;;  %vm966_vm14 = vcmp.ge.f32.partialorder %v876_v0, 0.0 }
 0x1e3   : > { %vm969_vm15 = vcmp.ge.f32.partialorder %v887_v26, 0.0  ;;  %v1001_v30 = vmul.f32 0.01, %v887_v26  ;;  %2015 = vmatpush3.bf16.msra.mxu0 %v2341_v23  ;;  %v1032_v31 = vsel %vm968_vm13, %v884_v17, %v1000_v21 }
 0x1e4   : > { %vm967_vm0 = vcmp.ge.f32.partialorder %v879_v29, 0.0  ;;  %v999_v22 = vmul.f32 0.01, %v879_v29  ;;  %2016 = vmatprep.subr.bf16.mxu0 %v2348_v24  ;;  %v1030_v34 = vsel %vm966_vm14, %v876_v0, %v998_v28 }
 0x1e5   : > { %v1033_v32 = vsel %vm969_vm15, %v887_v26, %v1001_v30 }
 0x1e6   : > { %v1944_v33 = vpop.f32.mrb[16].mxu1  ;;  %v1031_v35 = vsel %vm967_vm0, %v879_v29, %v999_v22  ;;  %v1057_v36 = vpack.c.bf16 %v1033_v32, %v1032_v31 }
 0x1e7   : > { %v900_v37 = vadd.f32 %v1944_v33, %v2356_v25  ;;  %v891_v38 = vpop.f32.mrb[17].mxu1  ;;  %v1056_v39 = vpack.c.bf16 %v1031_v35, %v1030_v34  ;;  %2017 = vmatpush3.bf16.msra.mxu0 %v2348_v24 }
 0x1e8   : > { %v892_v40 = vadd.f32 %v2356_v25, %v891_v38  ;;  %v1945_v41 = vpop.f32.mrb[18].mxu1 }
 0x1e9   : > { %v1004_v23 = vmul.f32 0.01, %v900_v37  ;;  %v903_v42 = vadd.f32 %v1945_v41, %v2356_v25  ;;  %v894_v43 = vpop.f32.mrb[19].mxu1  ;;  %1986 = vmatprep.mubr.bf16.mxu0 %v1056_v39  ;;  %vm972_vm1 = vcmp.ge.f32.partialorder %v900_v37, 0.0 }
 0x1ea   : > { %v1002_v44 = vmul.f32 0.01, %v892_v40  ;;  %v895_v45 = vadd.f32 %v2356_v25, %v894_v43  ;;  %1987 = vmatmul.mubr.bf16.gmra.mrb[44].mxu0 %v1057_v36  ;;  %vm970_vm2 = vcmp.ge.f32.partialorder %v892_v40, 0.0 }
 0x1eb   : > { %vm973_vm3 = vcmp.ge.f32.partialorder %v903_v42, 0.0  ;;  %v1005_v46 = vmul.f32 0.01, %v903_v42  ;;  %v1036_v48 = vsel %vm972_vm1, %v900_v37, %v1004_v23 }
 0x1ec   : > { %vm971_vm4 = vcmp.ge.f32.partialorder %v895_v45, 0.0  ;;  %v1003_v47 = vmul.f32 0.01, %v895_v45  ;;  %v1034_v50 = vsel %vm970_vm2, %v892_v40, %v1002_v44 }
 0x1ed   : > { %v1037_v24 = vsel %vm973_vm3, %v903_v42, %v1005_v46  ;;  %v2409_v46 = vld [vmem:[%s2560_s6] ss:$0 sm:$0xff] }
 0x1ee   : > { %v1948_v49 = vpop.f32.mrb[20].mxu1  ;;  %v1035_v51 = vsel %vm971_vm4, %v895_v45, %v1003_v47  ;;  %v1059_v52 = vpack.c.bf16 %v1037_v24, %v1036_v48  ;;  %v2101_v45 = vld [vmem:[%s2561_s7 + $0x30] sm:$0xff]  }
 0x1ef   : > { %v916_v53 = vadd.f32 %v1948_v49, %v2356_v25  ;;  %v907_v54 = vpop.f32.mrb[21].mxu1  ;;  %v1058_v55 = vpack.c.bf16 %v1035_v51, %v1034_v50  ;;  %2060 = vmatprep.subr.bf16.mxu1 %v2101_v45  ;;  %2018 = vmatprep.subr.bf16.mxu0 %v2101_v45 }
 0x1f0   : > { %v908_v56 = vadd.f32 %v2356_v25, %v907_v54  ;;  %v1949_v57 = vpop.f32.mrb[22].mxu1  ;;  %2068 = vmatpush3.bf16.msra.mxu1 %v2101_v45  ;;  %2019 = vmatpush3.bf16.msra.mxu0 %v2101_v45 }
 0x1f1   : > { %v1008_v58 = vmul.f32 0.01, %v916_v53  ;;  %v919_v59 = vadd.f32 %v1949_v57, %v2356_v25  ;;  %v910_v60 = vpop.f32.mrb[23].mxu1  ;;  %1990 = vmatprep.mubr.bf16.mxu0 %v1058_v55  ;;  %vm976_vm5 = vcmp.ge.f32.partialorder %v916_v53, 0.0 }
 0x1f2   : > { %v1006_v61 = vmul.f32 0.01, %v908_v56  ;;  %v911_v62 = vadd.f32 %v2356_v25, %v910_v60  ;;  %1991 = vmatmul.mubr.bf16.gmra.mrb[48].mxu0 %v1059_v52  ;;  %vm974_vm6 = vcmp.ge.f32.partialorder %v908_v56, 0.0 }
 0x1f3   : > { %vm977_vm7 = vcmp.ge.f32.partialorder %v919_v59, 0.0  ;;  %v1009_v63 = vmul.f32 0.01, %v919_v59  ;;  %v1040_v2 = vsel %vm976_vm5, %v916_v53, %v1008_v58 }
 0x1f4   : > { %vm975_vm8 = vcmp.ge.f32.partialorder %v911_v62, 0.0  ;;  %v1007_v1 = vmul.f32 0.01, %v911_v62  ;;  %v1038_v5 = vsel %vm974_vm6, %v908_v56, %v1006_v61 }
 0x1f5   : > { %v1041_v3 = vsel %vm977_vm7, %v919_v59, %v1009_v63 }
 0x1f6   : > { %v1952_v4 = vpop.f32.mrb[24].mxu1  ;;  %v1039_v6 = vsel %vm975_vm8, %v911_v62, %v1007_v1  ;;  %v1061_v7 = vpack.c.bf16 %v1041_v3, %v1040_v2 }
 0x1f7   : > { %v932_v8 = vadd.f32 %v1952_v4, %v2356_v25  ;;  %v923_v9 = vpop.f32.mrb[25].mxu1  ;;  %v1060_v10 = vpack.c.bf16 %v1039_v6, %v1038_v5 }
 0x1f8   : > { %v924_v11 = vadd.f32 %v2356_v25, %v923_v9  ;;  %v1953_v12 = vpop.f32.mrb[26].mxu1 }
 0x1f9   : > { %v1012_v13 = vmul.f32 0.01, %v932_v8  ;;  %v935_v14 = vadd.f32 %v1953_v12, %v2356_v25  ;;  %v926_v15 = vpop.f32.mrb[27].mxu1  ;;  %1994 = vmatprep.mubr.bf16.mxu0 %v1060_v10  ;;  %vm980_vm9 = vcmp.ge.f32.partialorder %v932_v8, 0.0 }
 0x1fa   : > { %v1010_v16 = vmul.f32 0.01, %v924_v11  ;;  %v927_v17 = vadd.f32 %v2356_v25, %v926_v15  ;;  %1995 = vmatmul.mubr.bf16.gmra.mrb[52].mxu0 %v1061_v7  ;;  %vm978_vm10 = vcmp.ge.f32.partialorder %v924_v11, 0.0 }
 0x1fb   : > { %vm981_vm11 = vcmp.ge.f32.partialorder %v935_v14, 0.0  ;;  %v1013_v18 = vmul.f32 0.01, %v935_v14  ;;  %v1044_v0 = vsel %vm980_vm9, %v932_v8, %v1012_v13 }
 0x1fc   : > { %vm979_vm12 = vcmp.ge.f32.partialorder %v927_v17, 0.0  ;;  %v1011_v19 = vmul.f32 0.01, %v927_v17  ;;  %v1042_v26 = vsel %vm978_vm10, %v924_v11, %v1010_v16 }
 0x1fd   : > { %v1045_v20 = vsel %vm981_vm11, %v935_v14, %v1013_v18 }
 0x1fe   : > { %v1956_v21 = vpop.f32.mrb[28].mxu1  ;;  %v1043_v27 = vsel %vm979_vm12, %v927_v17, %v1011_v19  ;;  %v1063_v28 = vpack.c.bf16 %v1045_v20, %v1044_v0 }
 0x1ff   : > { %v948_v29 = vadd.f32 %v1956_v21, %v2356_v25  ;;  %v939_v30 = vpop.f32.mrb[29].mxu1  ;;  %v1062_v22 = vpack.c.bf16 %v1043_v27, %v1042_v26 }
 0x200   : > { %v940_v31 = vadd.f32 %v2356_v25, %v939_v30  ;;  %v1957_v32 = vpop.f32.mrb[30].mxu1 }
 0x201   : > { %v1016_v33 = vmul.f32 0.01, %v948_v29  ;;  %v951_v34 = vadd.f32 %v1957_v32, %v2356_v25  ;;  %v942_v35 = vpop.f32.mrb[31].mxu1  ;;  %1998 = vmatprep.mubr.bf16.mxu0 %v1062_v22  ;;  %vm984_vm13 = vcmp.ge.f32.partialorder %v948_v29, 0.0 }
 0x202   : > { %v1014_v36 = vmul.f32 0.01, %v940_v31  ;;  %v943_v37 = vadd.f32 %v2356_v25, %v942_v35  ;;  %1999 = vmatmul.mubr.bf16.gmra.mrb[56].mxu0 %v1063_v28  ;;  %vm982_vm14 = vcmp.ge.f32.partialorder %v940_v31, 0.0  ;;  %v2102_v25 = vld [vmem:[%s2561_s7 + $0x38] sm:$0xff]  }
 0x203   : > { %vm985_vm15 = vcmp.ge.f32.partialorder %v951_v34, 0.0  ;;  %v1017_v38 = vmul.f32 0.01, %v951_v34  ;;  %v1048_v40 = vsel %vm984_vm13, %v948_v29, %v1016_v33  ;;  %2020 = vmatprep.subr.bf16.mxu0 %v2102_v25  ;;  %2061 = vmatprep.subr.bf16.mxu1 %v2102_v25 }
 0x204   : > { %vm983_vm0 = vcmp.ge.f32.partialorder %v943_v37, 0.0  ;;  %v1015_v39 = vmul.f32 0.01, %v943_v37  ;;  %v1046_v23 = vsel %vm982_vm14, %v940_v31, %v1014_v36  ;;  %2021 = vmatpush3.bf16.msra.mxu0 %v2102_v25  ;;  %2069 = vmatpush3.bf16.msra.mxu1 %v2102_v25 }
 0x205   : > { %v1049_v41 = vsel %vm985_vm15, %v951_v34, %v1017_v38 }
 0x206   : > { %v1047_v42 = vsel %vm983_vm0, %v943_v37, %v1015_v39  ;;  %v1065_v43 = vpack.c.bf16 %v1049_v41, %v1048_v40 }
 0x207   : > { %v1064_v44 = vpack.c.bf16 %v1047_v42, %v1046_v23 }
 0x209   : > { %2002 = vmatprep.mubr.bf16.mxu0 %v1064_v44 }
 0x20a   : > { %2003 = vmatmul.mubr.bf16.gmra.mrb[60].mxu0 %v1065_v43 }
 0x2a5   : > { %v1976_v47 = vpop.f32.mrb[32].mxu0 }
 0x2a6   : > { %v1180_v48 = vadd.f32 %v1976_v47, %v2409_v46  ;;  %v1171_v24 = vpop.f32.mrb[33].mxu0 }
 0x2a7   : > { %v1172_v49 = vadd.f32 %v2409_v46, %v1171_v24  ;;  %v1977_v50 = vpop.f32.mrb[34].mxu0 }
 0x2a8   : > { %v1332_v51 = vmul.f32 0.01, %v1180_v48  ;;  %v1183_v52 = vadd.f32 %v1977_v50, %v2409_v46  ;;  %v1174_v53 = vpop.f32.mrb[35].mxu0  ;;  %vm1300_vm1 = vcmp.ge.f32.partialorder %v1180_v48, 0.0 }
 0x2a9   : > { %v1330_v54 = vmul.f32 0.01, %v1172_v49  ;;  %v1175_v55 = vadd.f32 %v2409_v46, %v1174_v53  ;;  %vm1298_vm2 = vcmp.ge.f32.partialorder %v1172_v49, 0.0 }
 0x2aa   : > { %vm1301_vm3 = vcmp.ge.f32.partialorder %v1183_v52, 0.0  ;;  %v1333_v56 = vmul.f32 0.01, %v1183_v52  ;;  %v1364_v58 = vsel %vm1300_vm1, %v1180_v48, %v1332_v51 }
 0x2ab   : > { %vm1299_vm4 = vcmp.ge.f32.partialorder %v1175_v55, 0.0  ;;  %v1331_v57 = vmul.f32 0.01, %v1175_v55  ;;  %v1362_v62 = vsel %vm1298_vm2, %v1172_v49, %v1330_v54 }
 0x2ac   : > { %v1365_v59 = vsel %vm1301_vm3, %v1183_v52, %v1333_v56 }
 0x2ad   : > { %v1395_v60 = vpack.c.bf16 %v1365_v59, %v1364_v58  ;;  %v1980_v61 = vpop.f32.mrb[36].mxu0  ;;  %v1363_v63 = vsel %vm1299_vm4, %v1175_v55, %v1331_v57 }
 0x2ae   : > { %v1196_v1 = vadd.f32 %v1980_v61, %v2409_v46  ;;  %v1187_v2 = vpop.f32.mrb[37].mxu0  ;;  %v1394_v3 = vpack.c.bf16 %v1363_v63, %v1362_v62 }
 0x2af   : > { %v1188_v4 = vadd.f32 %v2409_v46, %v1187_v2  ;;  %v1981_v5 = vpop.f32.mrb[38].mxu0 }
 0x2b0   : > { %v1336_v6 = vmul.f32 0.01, %v1196_v1  ;;  %v1199_v7 = vadd.f32 %v1981_v5, %v2409_v46  ;;  %v1190_v8 = vpop.f32.mrb[39].mxu0  ;;  %2022 = vmatprep.mubr.bf16.mxu0 %v1394_v3  ;;  %vm1304_vm5 = vcmp.ge.f32.partialorder %v1196_v1, 0.0 }
 0x2b1   : > { %v1334_v9 = vmul.f32 0.01, %v1188_v4  ;;  %v1191_v10 = vadd.f32 %v2409_v46, %v1190_v8  ;;  %2023 = vmatmul.mubr.bf16.vlgmr.msra.gmra.mrb[64].mxu0 %v1395_v60  ;;  %vm1302_vm6 = vcmp.ge.f32.partialorder %v1188_v4, 0.0 }
 0x2b2   : > { %vm1305_vm7 = vcmp.ge.f32.partialorder %v1199_v7, 0.0  ;;  %v1337_v11 = vmul.f32 0.01, %v1199_v7  ;;  %v1368_v13 = vsel %vm1304_vm5, %v1196_v1, %v1336_v6 }
 0x2b3   : > { %vm1303_vm8 = vcmp.ge.f32.partialorder %v1191_v10, 0.0  ;;  %v1335_v12 = vmul.f32 0.01, %v1191_v10  ;;  %v1366_v17 = vsel %vm1302_vm6, %v1188_v4, %v1334_v9 }
 0x2b4   : > { %v1369_v14 = vsel %vm1305_vm7, %v1199_v7, %v1337_v11 }
 0x2b5   : > { %v1397_v15 = vpack.c.bf16 %v1369_v14, %v1368_v13  ;;  %v1984_v16 = vpop.f32.mrb[40].mxu0  ;;  %v1367_v18 = vsel %vm1303_vm8, %v1191_v10, %v1335_v12 }
 0x2b6   : > { %v1212_v19 = vadd.f32 %v1984_v16, %v2409_v46  ;;  %v1203_v0 = vpop.f32.mrb[41].mxu0  ;;  %v1396_v20 = vpack.c.bf16 %v1367_v18, %v1366_v17 }
 0x2b7   : > { %v1204_v21 = vadd.f32 %v2409_v46, %v1203_v0  ;;  %v1985_v26 = vpop.f32.mrb[42].mxu0 }
 0x2b8   : > { %v1340_v27 = vmul.f32 0.01, %v1212_v19  ;;  %v1215_v28 = vadd.f32 %v1985_v26, %v2409_v46  ;;  %v1206_v29 = vpop.f32.mrb[43].mxu0  ;;  %2026 = vmatprep.mubr.bf16.mxu1 %v1396_v20  ;;  %vm1308_vm9 = vcmp.ge.f32.partialorder %v1212_v19, 0.0 }
 0x2b9   : > { %v1338_v30 = vmul.f32 0.01, %v1204_v21  ;;  %v1207_v22 = vadd.f32 %v2409_v46, %v1206_v29  ;;  %2027 = vmatmul.mubr.bf16.vlgmr.msra.gmra.mrb[32].mxu1 %v1397_v15  ;;  %vm1306_vm10 = vcmp.ge.f32.partialorder %v1204_v21, 0.0 }
 0x2ba   : > { %vm1309_vm11 = vcmp.ge.f32.partialorder %v1215_v28, 0.0  ;;  %v1341_v31 = vmul.f32 0.01, %v1215_v28  ;;  %v1372_v33 = vsel %vm1308_vm9, %v1212_v19, %v1340_v27 }
 0x2bb   : > { %vm1307_vm12 = vcmp.ge.f32.partialorder %v1207_v22, 0.0  ;;  %v1339_v32 = vmul.f32 0.01, %v1207_v22  ;;  %v1370_v36 = vsel %vm1306_vm10, %v1204_v21, %v1338_v30 }
 0x2bc   : > { %v1373_v34 = vsel %vm1309_vm11, %v1215_v28, %v1341_v31 }
 0x2bd   : > { %v1988_v35 = vpop.f32.mrb[44].mxu0  ;;  %v1371_v37 = vsel %vm1307_vm12, %v1207_v22, %v1339_v32  ;;  %v1399_v38 = vpack.c.bf16 %v1373_v34, %v1372_v33 }
 0x2be   : > { %v1228_v39 = vadd.f32 %v1988_v35, %v2409_v46  ;;  %v1219_v40 = vpop.f32.mrb[45].mxu0  ;;  %v1398_v41 = vpack.c.bf16 %v1371_v37, %v1370_v36 }
 0x2bf   : > { %v1220_v23 = vadd.f32 %v2409_v46, %v1219_v40  ;;  %v1989_v42 = vpop.f32.mrb[46].mxu0 }
 0x2c0   : > { %v1344_v43 = vmul.f32 0.01, %v1228_v39  ;;  %v1231_v44 = vadd.f32 %v1989_v42, %v2409_v46  ;;  %v1222_v45 = vpop.f32.mrb[47].mxu0  ;;  %2030 = vmatprep.mubr.bf16.mxu1 %v1398_v41  ;;  %vm1312_vm13 = vcmp.ge.f32.partialorder %v1228_v39, 0.0 }
 0x2c1   : > { %v1342_v25 = vmul.f32 0.01, %v1220_v23  ;;  %v1223_v47 = vadd.f32 %v2409_v46, %v1222_v45  ;;  %2031 = vmatmul.mubr.bf16.gmra.mrb[36].mxu1 %v1399_v38  ;;  %vm1310_vm14 = vcmp.ge.f32.partialorder %v1220_v23, 0.0 }
 0x2c2   : > { %vm1313_vm15 = vcmp.ge.f32.partialorder %v1231_v44, 0.0  ;;  %v1345_v48 = vmul.f32 0.01, %v1231_v44  ;;  %v1376_v49 = vsel %vm1312_vm13, %v1228_v39, %v1344_v43 }
 0x2c3   : > { %vm1311_vm0 = vcmp.ge.f32.partialorder %v1223_v47, 0.0  ;;  %v1343_v24 = vmul.f32 0.01, %v1223_v47  ;;  %v1374_v52 = vsel %vm1310_vm14, %v1220_v23, %v1342_v25 }
 0x2c4   : > { %v1377_v50 = vsel %vm1313_vm15, %v1231_v44, %v1345_v48 }
 0x2c5   : > { %v1992_v51 = vpop.f32.mrb[48].mxu0  ;;  %v1375_v53 = vsel %vm1311_vm0, %v1223_v47, %v1343_v24  ;;  %v1401_v54 = vpack.c.bf16 %v1377_v50, %v1376_v49 }
 0x2c6   : > { %v1244_v55 = vadd.f32 %v1992_v51, %v2409_v46  ;;  %v1235_v56 = vpop.f32.mrb[49].mxu0  ;;  %v1400_v57 = vpack.c.bf16 %v1375_v53, %v1374_v52 }
 0x2c7   : > { %v1236_v58 = vadd.f32 %v2409_v46, %v1235_v56  ;;  %v1993_v59 = vpop.f32.mrb[50].mxu0 }
 0x2c8   : > { %v1348_v60 = vmul.f32 0.01, %v1244_v55  ;;  %v1247_v61 = vadd.f32 %v1993_v59, %v2409_v46  ;;  %v1238_v62 = vpop.f32.mrb[51].mxu0  ;;  %2034 = vmatprep.mubr.bf16.mxu1 %v1400_v57  ;;  %vm1316_vm1 = vcmp.ge.f32.partialorder %v1244_v55, 0.0 }
 0x2c9   : > { %v1346_v63 = vmul.f32 0.01, %v1236_v58  ;;  %v1239_v1 = vadd.f32 %v2409_v46, %v1238_v62  ;;  %2035 = vmatmul.mubr.bf16.gmra.mrb[40].mxu1 %v1401_v54  ;;  %vm1314_vm2 = vcmp.ge.f32.partialorder %v1236_v58, 0.0 }
 0x2ca   : > { %vm1317_vm3 = vcmp.ge.f32.partialorder %v1247_v61, 0.0  ;;  %v1349_v2 = vmul.f32 0.01, %v1247_v61  ;;  %v1380_v4 = vsel %vm1316_vm1, %v1244_v55, %v1348_v60  ;;  %vm1642_vm1 = vcmask 31744  }
 0x2cb   : > { %vm1315_vm4 = vcmp.ge.f32.partialorder %v1239_v1, 0.0  ;;  %v1347_v3 = vmul.f32 0.01, %v1239_v1  ;;  %v1378_v7 = vsel %vm1314_vm2, %v1236_v58, %v1346_v63 }
 0x2cc   : > { %v1381_v5 = vsel %vm1317_vm3, %v1247_v61, %v1349_v2 }
 0x2cd   : > { %v1996_v6 = vpop.f32.mrb[52].mxu0  ;;  %v1379_v8 = vsel %vm1315_vm4, %v1239_v1, %v1347_v3  ;;  %v1403_v9 = vpack.c.bf16 %v1381_v5, %v1380_v4  ;;  %v2446_v1 = vld [vmem:[%s2562_s8] ss:$0 sm:$0xff] }
 0x2ce   : > { %v1260_v10 = vadd.f32 %v1996_v6, %v2409_v46  ;;  %v1251_v11 = vpop.f32.mrb[53].mxu0  ;;  %v1402_v12 = vpack.c.bf16 %v1379_v8, %v1378_v7 }
 0x2cf   : > { %v1252_v13 = vadd.f32 %v2409_v46, %v1251_v11  ;;  %v1997_v14 = vpop.f32.mrb[54].mxu0 }
 0x2d0   : > { %v1352_v15 = vmul.f32 0.01, %v1260_v10  ;;  %v1263_v16 = vadd.f32 %v1997_v14, %v2409_v46  ;;  %v1254_v17 = vpop.f32.mrb[55].mxu0  ;;  %2038 = vmatprep.mubr.bf16.mxu1 %v1402_v12  ;;  %vm1320_vm5 = vcmp.ge.f32.partialorder %v1260_v10, 0.0 }
 0x2d1   : > { %v1350_v18 = vmul.f32 0.01, %v1252_v13  ;;  %v1255_v19 = vadd.f32 %v2409_v46, %v1254_v17  ;;  %2039 = vmatmul.mubr.bf16.gmra.mrb[44].mxu1 %v1403_v9  ;;  %vm1318_vm6 = vcmp.ge.f32.partialorder %v1252_v13, 0.0 }
 0x2d2   : > { %vm1321_vm7 = vcmp.ge.f32.partialorder %v1263_v16, 0.0  ;;  %v1353_v0 = vmul.f32 0.01, %v1263_v16  ;;  %v1384_v21 = vsel %vm1320_vm5, %v1260_v10, %v1352_v15 }
 0x2d3   : > { %vm1319_vm8 = vcmp.ge.f32.partialorder %v1255_v19, 0.0  ;;  %v1351_v20 = vmul.f32 0.01, %v1255_v19  ;;  %v1382_v28 = vsel %vm1318_vm6, %v1252_v13, %v1350_v18 }
 0x2d4   : > { %v1385_v26 = vsel %vm1321_vm7, %v1263_v16, %v1353_v0 }
 0x2d5   : > { %v2000_v27 = vpop.f32.mrb[56].mxu0  ;;  %v1383_v29 = vsel %vm1319_vm8, %v1255_v19, %v1351_v20  ;;  %v1405_v30 = vpack.c.bf16 %v1385_v26, %v1384_v21 }
 0x2d6   : > { %v1276_v22 = vadd.f32 %v2000_v27, %v2409_v46  ;;  %v1267_v31 = vpop.f32.mrb[57].mxu0  ;;  %v1404_v32 = vpack.c.bf16 %v1383_v29, %v1382_v28 }
 0x2d7   : > { %v1268_v33 = vadd.f32 %v2409_v46, %v1267_v31  ;;  %v2001_v34 = vpop.f32.mrb[58].mxu0 }
 0x2d8   : > { %v1356_v35 = vmul.f32 0.01, %v1276_v22  ;;  %v1279_v36 = vadd.f32 %v2001_v34, %v2409_v46  ;;  %v1270_v37 = vpop.f32.mrb[59].mxu0  ;;  %2042 = vmatprep.mubr.bf16.mxu1 %v1404_v32  ;;  %vm1324_vm9 = vcmp.ge.f32.partialorder %v1276_v22, 0.0 }
 0x2d9   : > { %v1354_v38 = vmul.f32 0.01, %v1268_v33  ;;  %v1271_v39 = vadd.f32 %v2409_v46, %v1270_v37  ;;  %2043 = vmatmul.mubr.bf16.gmra.mrb[48].mxu1 %v1405_v30  ;;  %vm1322_vm10 = vcmp.ge.f32.partialorder %v1268_v33, 0.0 }
 0x2da   : > { %vm1325_vm11 = vcmp.ge.f32.partialorder %v1279_v36, 0.0  ;;  %v1357_v40 = vmul.f32 0.01, %v1279_v36  ;;  %v1388_v23 = vsel %vm1324_vm9, %v1276_v22, %v1356_v35 }
 0x2db   : > { %vm1323_vm12 = vcmp.ge.f32.partialorder %v1271_v39, 0.0  ;;  %v1355_v41 = vmul.f32 0.01, %v1271_v39  ;;  %v1386_v44 = vsel %vm1322_vm10, %v1268_v33, %v1354_v38 }
 0x2dc   : > { %v1389_v42 = vsel %vm1325_vm11, %v1279_v36, %v1357_v40 }
 0x2dd   : > { %v2004_v43 = vpop.f32.mrb[60].mxu0  ;;  %v1387_v45 = vsel %vm1323_vm12, %v1271_v39, %v1355_v41  ;;  %v1407_v25 = vpack.c.bf16 %v1389_v42, %v1388_v23 }
 0x2de   : > { %v1292_v47 = vadd.f32 %v2004_v43, %v2409_v46  ;;  %v1283_v48 = vpop.f32.mrb[61].mxu0  ;;  %v1406_v24 = vpack.c.bf16 %v1387_v45, %v1386_v44 }
 0x2df   : > { %v1284_v49 = vadd.f32 %v2409_v46, %v1283_v48  ;;  %v2005_v50 = vpop.f32.mrb[62].mxu0 }
 0x2e0   : > { %v1360_v51 = vmul.f32 0.01, %v1292_v47  ;;  %v1295_v52 = vadd.f32 %v2005_v50, %v2409_v46  ;;  %v1286_v53 = vpop.f32.mrb[63].mxu0  ;;  %2046 = vmatprep.mubr.bf16.mxu1 %v1406_v24  ;;  %vm1328_vm13 = vcmp.ge.f32.partialorder %v1292_v47, 0.0 }
 0x2e1   : > { %v1358_v54 = vmul.f32 0.01, %v1284_v49  ;;  %v1287_v55 = vadd.f32 %v2409_v46, %v1286_v53  ;;  %2047 = vmatmul.mubr.bf16.gmra.mrb[52].mxu1 %v1407_v25  ;;  %vm1326_vm14 = vcmp.ge.f32.partialorder %v1284_v49, 0.0 }
 0x2e2   : > { %vm1329_vm15 = vcmp.ge.f32.partialorder %v1295_v52, 0.0  ;;  %v1361_v56 = vmul.f32 0.01, %v1295_v52  ;;  %v1392_v58 = vsel %vm1328_vm13, %v1292_v47, %v1360_v51 }
 0x2e3   : > { %vm1327_vm0 = vcmp.ge.f32.partialorder %v1287_v55, 0.0  ;;  %v1359_v57 = vmul.f32 0.01, %v1287_v55  ;;  %v1390_v60 = vsel %vm1326_vm14, %v1284_v49, %v1358_v54 }
 0x2e4   : > { %v1393_v59 = vsel %vm1329_vm15, %v1295_v52, %v1361_v56 }
 0x2e5   : > { %v1391_v61 = vsel %vm1327_vm0, %v1287_v55, %v1359_v57  ;;  %v1409_v62 = vpack.c.bf16 %v1393_v59, %v1392_v58 }
 0x2e6   : > { %v1408_v63 = vpack.c.bf16 %v1391_v61, %v1390_v60 }
 0x2e8   : > { %2050 = vmatprep.mubr.bf16.mxu1 %v1408_v63 }
 0x2e9   : > { %2051 = vmatmul.mubr.bf16.gmra.mrb[56].mxu1 %v1409_v62 }
 0x384   : > { %v2024_v46 = vpop.f32.mrb[64].mxu0 }
 0x385   : > { %v1524_v2 = vadd.f32 %v2024_v46, %v2446_v1  ;;  %v1515_v3 = vpop.f32.mrb[65].mxu0 }
 0x386   : > { %v1516_v4 = vadd.f32 %v2446_v1, %v1515_v3  ;;  %v2025_v5 = vpop.f32.mrb[66].mxu0 }
 0x387   : > { %1645 = vst.msk [vmem:[%s2453_s22 + $0x10] sm:$0xff] %vm1642_vm1, %v1524_v2  ;;  %v1527_v6 = vadd.f32 %v2025_v5, %v2446_v1  ;;  %v1518_v7 = vpop.f32.mrb[67].mxu0 }
 0x388   : > { %1643 = vst.msk [vmem:[%s2453_s22] sm:$0xff] %vm1642_vm1, %v1516_v4  ;;  %v1519_v8 = vadd.f32 %v2446_v1, %v1518_v7 }
 0x389   : > { %1646 = vst.msk [vmem:[%s2453_s22 + $0x18] sm:$0xff] %vm1642_vm1, %v1527_v6 }
 0x38a   : > { %1644 = vst.msk [vmem:[%s2453_s22 + $0x8] sm:$0xff] %vm1642_vm1, %v1519_v8 }
 0x38c   : > { %v2028_v9 = vpop.f32.mrb[32].mxu1 }
 0x38d   : > { %v1540_v10 = vadd.f32 %v2028_v9, %v2446_v1  ;;  %v1531_v11 = vpop.f32.mrb[33].mxu1 }
 0x38e   : > { %v1532_v12 = vadd.f32 %v2446_v1, %v1531_v11  ;;  %v2029_v13 = vpop.f32.mrb[34].mxu1 }
 0x38f   : > { %1649 = vst.msk [vmem:[%s2453_s22 + $0x30] sm:$0xff] %vm1642_vm1, %v1540_v10  ;;  %v1543_v14 = vadd.f32 %v2029_v13, %v2446_v1  ;;  %v1534_v15 = vpop.f32.mrb[35].mxu1 }
 0x390   : > { %1647 = vst.msk [vmem:[%s2453_s22 + $0x20] sm:$0xff] %vm1642_vm1, %v1532_v12  ;;  %v1535_v16 = vadd.f32 %v2446_v1, %v1534_v15 }
 0x391   : > { %1650 = vst.msk [vmem:[%s2453_s22 + $0x38] sm:$0xff] %vm1642_vm1, %v1543_v14 }
 0x392   : > { %1648 = vst.msk [vmem:[%s2453_s22 + $0x28] sm:$0xff] %vm1642_vm1, %v1535_v16 }
 0x394   : > { %v2032_v17 = vpop.f32.mrb[36].mxu1 }
 0x395   : > { %v1556_v18 = vadd.f32 %v2032_v17, %v2446_v1  ;;  %v1547_v19 = vpop.f32.mrb[37].mxu1 }
 0x396   : > { %v1548_v0 = vadd.f32 %v2446_v1, %v1547_v19  ;;  %v2033_v20 = vpop.f32.mrb[38].mxu1 }
 0x397   : > { %1653 = vst.msk [vmem:[%s2453_s22 + $0x50] sm:$0xff] %vm1642_vm1, %v1556_v18  ;;  %v1559_v21 = vadd.f32 %v2033_v20, %v2446_v1  ;;  %v1550_v26 = vpop.f32.mrb[39].mxu1 }
 0x398   : > { %1651 = vst.msk [vmem:[%s2453_s22 + $0x40] sm:$0xff] %vm1642_vm1, %v1548_v0  ;;  %v1551_v27 = vadd.f32 %v2446_v1, %v1550_v26 }
 0x399   : > { %1654 = vst.msk [vmem:[%s2453_s22 + $0x58] sm:$0xff] %vm1642_vm1, %v1559_v21 }
 0x39a   : > { %1652 = vst.msk [vmem:[%s2453_s22 + $0x48] sm:$0xff] %vm1642_vm1, %v1551_v27 }
 0x39c   : > { %v2036_v28 = vpop.f32.mrb[40].mxu1 }
 0x39d   : > { %v1572_v29 = vadd.f32 %v2036_v28, %v2446_v1  ;;  %v1563_v30 = vpop.f32.mrb[41].mxu1 }
 0x39e   : > { %v1564_v22 = vadd.f32 %v2446_v1, %v1563_v30  ;;  %v2037_v31 = vpop.f32.mrb[42].mxu1 }
 0x39f   : > { %1657 = vst.msk [vmem:[%s2453_s22 + $0x70] sm:$0xff] %vm1642_vm1, %v1572_v29  ;;  %v1575_v32 = vadd.f32 %v2037_v31, %v2446_v1  ;;  %v1566_v33 = vpop.f32.mrb[43].mxu1 }
 0x3a0   : > { %1655 = vst.msk [vmem:[%s2453_s22 + $0x60] sm:$0xff] %vm1642_vm1, %v1564_v22  ;;  %v1567_v34 = vadd.f32 %v2446_v1, %v1566_v33 }
 0x3a1   : > { %1658 = vst.msk [vmem:[%s2453_s22 + $0x78] sm:$0xff] %vm1642_vm1, %v1575_v32 }
 0x3a2   : > { %1656 = vst.msk [vmem:[%s2453_s22 + $0x68] sm:$0xff] %vm1642_vm1, %v1567_v34 }
 0x3a4   : > { %v2040_v35 = vpop.f32.mrb[44].mxu1 }
 0x3a5   : > { %v1588_v36 = vadd.f32 %v2040_v35, %v2446_v1  ;;  %v1579_v37 = vpop.f32.mrb[45].mxu1 }
 0x3a6   : > { %v1580_v38 = vadd.f32 %v2446_v1, %v1579_v37  ;;  %v2041_v39 = vpop.f32.mrb[46].mxu1 }
 0x3a7   : > { %1661 = vst.msk [vmem:[%s2453_s22 + $0x90] sm:$0xff] %vm1642_vm1, %v1588_v36  ;;  %v1591_v40 = vadd.f32 %v2041_v39, %v2446_v1  ;;  %v1582_v41 = vpop.f32.mrb[47].mxu1 }
 0x3a8   : > { %1659 = vst.msk [vmem:[%s2453_s22 + $0x80] sm:$0xff] %vm1642_vm1, %v1580_v38  ;;  %v1583_v23 = vadd.f32 %v2446_v1, %v1582_v41 }
 0x3a9   : > { %1662 = vst.msk [vmem:[%s2453_s22 + $0x98] sm:$0xff] %vm1642_vm1, %v1591_v40 }
 0x3aa   : > { %1660 = vst.msk [vmem:[%s2453_s22 + $0x88] sm:$0xff] %vm1642_vm1, %v1583_v23 }
 0x3ac   : > { %v2044_v42 = vpop.f32.mrb[48].mxu1 }
 0x3ad   : > { %v1604_v43 = vadd.f32 %v2044_v42, %v2446_v1  ;;  %v1595_v44 = vpop.f32.mrb[49].mxu1 }
 0x3ae   : > { %v1596_v45 = vadd.f32 %v2446_v1, %v1595_v44  ;;  %v2045_v25 = vpop.f32.mrb[50].mxu1 }
 0x3af   : > { %1665 = vst.msk [vmem:[%s2453_s22 + $0xb0] sm:$0xff] %vm1642_vm1, %v1604_v43  ;;  %v1607_v47 = vadd.f32 %v2045_v25, %v2446_v1  ;;  %v1598_v48 = vpop.f32.mrb[51].mxu1 }
 0x3b0   : > { %1663 = vst.msk [vmem:[%s2453_s22 + $0xa0] sm:$0xff] %vm1642_vm1, %v1596_v45  ;;  %v1599_v24 = vadd.f32 %v2446_v1, %v1598_v48 }
 0x3b1   : > { %1666 = vst.msk [vmem:[%s2453_s22 + $0xb8] sm:$0xff] %vm1642_vm1, %v1607_v47 }
 0x3b2   : > { %1664 = vst.msk [vmem:[%s2453_s22 + $0xa8] sm:$0xff] %vm1642_vm1, %v1599_v24 }
 0x3b4   : > { %v2048_v49 = vpop.f32.mrb[52].mxu1 }
 0x3b5   : > { %v1620_v50 = vadd.f32 %v2048_v49, %v2446_v1  ;;  %v1611_v51 = vpop.f32.mrb[53].mxu1 }
 0x3b6   : > { %v1612_v52 = vadd.f32 %v2446_v1, %v1611_v51  ;;  %v2049_v53 = vpop.f32.mrb[54].mxu1 }
 0x3b7   : > { %1669 = vst.msk [vmem:[%s2453_s22 + $0xd0] sm:$0xff] %vm1642_vm1, %v1620_v50  ;;  %v1623_v54 = vadd.f32 %v2049_v53, %v2446_v1  ;;  %v1614_v55 = vpop.f32.mrb[55].mxu1 }
 0x3b8   : > { %1667 = vst.msk [vmem:[%s2453_s22 + $0xc0] sm:$0xff] %vm1642_vm1, %v1612_v52  ;;  %v1615_v56 = vadd.f32 %v2446_v1, %v1614_v55 }
 0x3b9   : > { %1670 = vst.msk [vmem:[%s2453_s22 + $0xd8] sm:$0xff] %vm1642_vm1, %v1623_v54 }
 0x3ba   : > { %1668 = vst.msk [vmem:[%s2453_s22 + $0xc8] sm:$0xff] %vm1642_vm1, %v1615_v56 }
 0x3bc   : > { %v2052_v57 = vpop.f32.mrb[56].mxu1 }
 0x3bd   : > { %v1636_v58 = vadd.f32 %v2052_v57, %v2446_v1  ;;  %v1627_v59 = vpop.f32.mrb[57].mxu1 }
 0x3be   : > { %v1628_v60 = vadd.f32 %v2446_v1, %v1627_v59  ;;  %v2053_v61 = vpop.f32.mrb[58].mxu1 }
 0x3bf   : > { %1673 = vst.msk [vmem:[%s2453_s22 + $0xf0] sm:$0xff] %vm1642_vm1, %v1636_v58  ;;  %v1639_v62 = vadd.f32 %v2053_v61, %v2446_v1  ;;  %v1630_v63 = vpop.f32.mrb[59].mxu1 }
 0x3c0   : > { %1671 = vst.msk [vmem:[%s2453_s22 + $0xe0] sm:$0xff] %vm1642_vm1, %v1628_v60  ;;  %v1631_v46 = vadd.f32 %v2446_v1, %v1630_v63 }
 0x3c1   : > { %1674 = vst.msk [vmem:[%s2453_s22 + $0xf8] sm:$0xff] %vm1642_vm1, %v1639_v62 }
 0x3c2   : > { %1672 = vst.msk [vmem:[%s2453_s22 + $0xe8] sm:$0xff] %vm1642_vm1, %v1631_v46 }
 0x3c3 PF: > { %s19_s30 = sadd.s32 1, %s2109_s30  }
 0x3c4   : > { %p16_p4 = scmp.ge.s32.totalorder %s19_s30, 4  }
 0x3c6   :  { %18 = sbr.rel (!%p16_p4) target bundleno = 1 (0x1), region = 86 }

</bundles_post_ra>
